<compile_context>
chip_gen: v6e
topology: v6e:2x2x1
jax: 0.10.0
libtpu: 0.0.40
codegen_flags: <defaults>
</compile_context>

<pallas_src>
import jax
import jax.numpy as jnp
import numpy as np
from jax.experimental import pallas as pl
from jax.experimental.pallas import tpu as pltpu


def gru_kernel(x_ref, h0_ref, wih_ref, whh_ref, bih_ref, bhh_ref, out_ref):
    """One direction of the bidirectional GRU; full time loop inside.

    Block views (direction dim squeezed by BlockSpec):
      x_ref   : (T, B, E)   time-major embedded inputs (shared by both dirs)
      h0_ref  : (B, H)      initial hidden for this direction
      wih_ref : (E, 3H)     fused input->hidden weights, gate order (r, z, n)
      whh_ref : (H, 3H)     fused hidden->hidden weights
      bih_ref : (1, 3H)     fused input biases
      bhh_ref : (1, 3H)     fused hidden biases
      out_ref : (T, B, H)   per-step hiddens for this direction (resident)
    """
    T = x_ref.shape[0]
    H = h0_ref.shape[-1]

    d = pl.program_id(0)          # 0 = forward, 1 = backward
    base = d * (T - 1)            # first sequence position for this direction
    rev = 1 - 2 * d               # +1 forward, -1 backward

    # Hoisted once per direction: weights / biases loaded outside the loop.
    wih = wih_ref[...]            # (E, 3H)
    whh = whh_ref[...]            # (H, 3H)
    bih = bih_ref[...]            # (1, 3H)
    bhh = bhh_ref[...]            # (1, 3H)

    h = h0_ref[...].astype(jnp.float32)   # (B, H) recurrent carry

    # T is small and static: statically unrolled time loop, 2 fused matmuls
    # per step, gate math in f32.
    for t in range(T):
        s = base + rev * t                 # sequence position for this step
        x = x_ref[s]                       # (B, E)
        gx = jnp.dot(x, wih, preferred_element_type=jnp.float32) + bih
        gh = jnp.dot(h, whh, preferred_element_type=jnp.float32) + bhh
        r = jax.nn.sigmoid(gx[:, :H] + gh[:, :H])
        z = jax.nn.sigmoid(gx[:, H:2 * H] + gh[:, H:2 * H])
        n = jnp.tanh(gx[:, 2 * H:] + r * gh[:, 2 * H:])
        h = (1.0 - z) * n + z * h
        out_ref[s] = h.astype(out_ref.dtype)


def encoder_rnn_forward(token_ids, h0, params):
    """EncoderRNN.forward(input, hidden) -> (output, h_n).

    token_ids : (B, T) int32
    h0        : (2, B, H) float32
    returns   : output (B, T, 2H), h_n (2, B, H)
    """
    emb = params["embedding"]                        # (V, E), row 0 == 0 (padding_idx)
    embedded = jnp.take(emb, token_ids, axis=0)      # (B, T, E)
    x_tm = jnp.transpose(embedded, (1, 0, 2))        # (T, B, E)  time-major

    T, B, E = x_tm.shape
    H = h0.shape[-1]
    G = 3 * H

    # Fuse the 3 per-gate matrices into single (E,3H)/(H,3H) operands so the
    # kernel does 2 matmuls per step instead of 6.
    wih_f = jnp.transpose(params["w_ih"], (0, 2, 1, 3)).reshape(2, E, G)
    whh_f = jnp.transpose(params["w_hh"], (0, 2, 1, 3)).reshape(2, H, G)
    bih_f = jnp.transpose(params["b_ih"], (0, 2, 1, 3)).reshape(2, 1, G)
    bhh_f = jnp.transpose(params["b_hh"], (0, 2, 1, 3)).reshape(2, 1, G)

    out_seq = pl.pallas_call(
        gru_kernel,
        out_shape=jax.ShapeDtypeStruct((2, T, B, H), jnp.float32),
        grid_spec=pltpu.PrefetchScalarGridSpec(
            num_scalar_prefetch=0,
            grid=(2,),
            in_specs=[
                pl.BlockSpec((T, B, E), lambda d: (0, 0, 0)),      # shared x
                pl.BlockSpec((None, B, H), lambda d: (d, 0, 0)),   # h0[d]
                pl.BlockSpec((None, E, G), lambda d: (d, 0, 0)),   # W_ih[d]
                pl.BlockSpec((None, H, G), lambda d: (d, 0, 0)),   # W_hh[d]
                pl.BlockSpec((None, 1, G), lambda d: (d, 0, 0)),   # b_ih[d]
                pl.BlockSpec((None, 1, G), lambda d: (d, 0, 0)),   # b_hh[d]
            ],
            out_specs=pl.BlockSpec((None, T, B, H), lambda d: (d, 0, 0, 0)),
        ),
        compiler_params=pltpu.CompilerParams(
            dimension_semantics=("parallel",)),
    )(x_tm, h0, wih_f, whh_f, bih_f, bhh_f)

    # out_seq[d, s] = hidden of direction d at sequence position s.
    output = jnp.concatenate([out_seq[0], out_seq[1]], axis=-1)   # (T, B, 2H)
    output = jnp.transpose(output, (1, 0, 2))                     # (B, T, 2H)
    # Final hiddens: forward ends at s=T-1, backward ends at s=0.
    h_n = jnp.stack([out_seq[0, T - 1], out_seq[1, 0]], axis=0)   # (2, B, H)
    return output, h_n


def ref_forward(token_ids, h0, params):
    """Pure-JAX reference (mirrors torch.nn.GRU, bidirectional, batch_first)."""
    emb = params["embedding"]
    x = jnp.take(emb, token_ids, axis=0)          # (B, T, E)
    B, T, _ = x.shape
    outs, h_fin = [], []
    for d in range(2):
        wih, whh = params["w_ih"][d], params["w_hh"][d]
        bih, bhh = params["b_ih"][d], params["b_hh"][d]
        h = h0[d]
        seq = range(T) if d == 0 else range(T - 1, -1, -1)
        out_d = [None] * T
        for t in seq:
            xt = x[:, t]
            r = jax.nn.sigmoid(xt @ wih[0] + bih[0] + h @ whh[0] + bhh[0])
            z = jax.nn.sigmoid(xt @ wih[1] + bih[1] + h @ whh[1] + bhh[1])
            n = jnp.tanh(xt @ wih[2] + bih[2] + r * (h @ whh[2] + bhh[2]))
            h = (1.0 - z) * n + z * h
            out_d[t] = h
        outs.append(jnp.stack(out_d, axis=1))     # (B, T, H)
        h_fin.append(h)
    return jnp.concatenate(outs, axis=-1), jnp.stack(h_fin, axis=0)


def init_params(key, vocab_size, embedding_size, hidden_size):
    H = hidden_size // 2
    E = embedding_size
    k_emb, k1, k2, k3, k4 = jax.random.split(key, 5)
    bound = 1.0 / (H ** 0.5)
    emb = jax.random.normal(k_emb, (vocab_size, E), jnp.float32)
    emb = emb.at[0].set(0.0)                       # padding_idx = 0
    u = lambda k, s: jax.random.uniform(k, s, jnp.float32, -bound, bound)
    return {
        "embedding": emb,
        "w_ih": u(k1, (2, 3, E, H)),   # gate order (r, z, n), stored (in, out)
        "w_hh": u(k2, (2, 3, H, H)),
        "b_ih": u(k3, (2, 3, 1, H)),
        "b_hh": u(k4, (2, 3, 1, H)),
    }


if __name__ == "__main__":
    VOCAB, EMB, HIDDEN = 50, 16, 32      # EncoderRNN(vocab_size=50, embedding_size=16, hidden_size=32)
    B, T = 2, 8
    H = HIDDEN // 2

    key = jax.random.PRNGKey(0)
    k_params, k_tok = jax.random.split(key)
    params = init_params(k_params, VOCAB, EMB, HIDDEN)

    token_ids = jax.random.randint(k_tok, (B, T), 0, VOCAB, dtype=jnp.int32)
    h0 = jnp.zeros((2, B, H), jnp.float32)          # EncoderRNN.init_hidden

    output, h_n = encoder_rnn_forward(token_ids, h0, params)
    output, h_n = jax.block_until_ready((output, h_n))

    ref_out, ref_hn = ref_forward(token_ids, h0, params)
    assert output.shape == (B, T, HIDDEN)
    assert h_n.shape == (2, B, H)
    np.testing.assert_allclose(np.asarray(output), np.asarray(ref_out),
                               rtol=1e-4, atol=1e-4)
    np.testing.assert_allclose(np.asarray(h_n), np.asarray(ref_hn),
                               rtol=1e-4, atol=1e-4)
    print("KERNEL_OK")
</pallas_src>

<mosaic_0001>
module attributes {stable_mosaic.version = 11 : i64} {
  func.func @gru_kernel(%arg0: i32, %arg1: memref<8x2x16xf32, #tpu.memory_space<vmem>>, %arg2: memref<1x2x16xf32, #tpu.memory_space<vmem>>, %arg3: memref<1x16x48xf32, #tpu.memory_space<vmem>>, %arg4: memref<1x16x48xf32, #tpu.memory_space<vmem>>, %arg5: memref<1x1x48xf32, #tpu.memory_space<vmem>>, %arg6: memref<1x1x48xf32, #tpu.memory_space<vmem>>, %arg7: memref<1x8x2x16xf32, #tpu.memory_space<vmem>>) attributes {dimension_semantics = [#tpu.dimension_semantics<parallel>], iteration_bounds = array<i64: 2>, scalar_prefetch = 0 : i64, scratch_operands = 0 : i64, tpu.core_type = #tpu.core_type<tc>, window_params = [{pipeline_mode = #tpu.pipeline_mode<synchronous>, transform_indices = @transform_0, window_bounds = array<i64: 8, 2, 16>}, {transform_indices = @transform_1, window_bounds = array<i64: 1, 2, 16>}, {transform_indices = @transform_2, window_bounds = array<i64: 1, 16, 48>}, {transform_indices = @transform_3, window_bounds = array<i64: 1, 16, 48>}, {transform_indices = @transform_4, window_bounds = array<i64: 1, 1, 48>}, {transform_indices = @transform_5, window_bounds = array<i64: 1, 1, 48>}, {transform_indices = @transform_6, window_bounds = array<i64: 1, 8, 2, 16>}]} {
    %c7_i32 = arith.constant 7 : i32
    %0 = arith.muli %arg0, %c7_i32 : i32
    %c2_i32 = arith.constant 2 : i32
    %1 = arith.muli %c2_i32, %arg0 : i32
    %c1_i32 = arith.constant 1 : i32
    %2 = arith.subi %c1_i32, %1 : i32
    %c0 = arith.constant 0 : index
    %c0_0 = arith.constant 0 : index
    %c0_1 = arith.constant 0 : index
    %3 = vector.load %arg3[%c0, %c0_0, %c0_1] : memref<1x16x48xf32, #tpu.memory_space<vmem>>, vector<1x16x48xf32>
    %4 = vector.shape_cast %3 : vector<1x16x48xf32> to vector<16x48xf32>
    %c0_2 = arith.constant 0 : index
    %c0_3 = arith.constant 0 : index
    %c0_4 = arith.constant 0 : index
    %5 = vector.load %arg4[%c0_2, %c0_3, %c0_4] : memref<1x16x48xf32, #tpu.memory_space<vmem>>, vector<1x16x48xf32>
    %6 = vector.shape_cast %5 : vector<1x16x48xf32> to vector<16x48xf32>
    %c0_5 = arith.constant 0 : index
    %c0_6 = arith.constant 0 : index
    %c0_7 = arith.constant 0 : index
    %7 = vector.load %arg5[%c0_5, %c0_6, %c0_7] : memref<1x1x48xf32, #tpu.memory_space<vmem>>, vector<1x1x48xf32>
    %8 = vector.shape_cast %7 : vector<1x1x48xf32> to vector<1x48xf32>
    %c0_8 = arith.constant 0 : index
    %c0_9 = arith.constant 0 : index
    %c0_10 = arith.constant 0 : index
    %9 = vector.load %arg6[%c0_8, %c0_9, %c0_10] : memref<1x1x48xf32, #tpu.memory_space<vmem>>, vector<1x1x48xf32>
    %10 = vector.shape_cast %9 : vector<1x1x48xf32> to vector<1x48xf32>
    %c0_11 = arith.constant 0 : index
    %c0_12 = arith.constant 0 : index
    %c0_13 = arith.constant 0 : index
    %11 = vector.load %arg2[%c0_11, %c0_12, %c0_13] : memref<1x2x16xf32, #tpu.memory_space<vmem>>, vector<1x2x16xf32>
    %12 = vector.shape_cast %11 : vector<1x2x16xf32> to vector<2x16xf32>
    %c0_i32 = arith.constant 0 : i32
    %13 = arith.muli %2, %c0_i32 : i32
    %14 = arith.addi %0, %13 : i32
    %15 = arith.index_cast %14 : i32 to index
    %c0_14 = arith.constant 0 : index
    %c0_15 = arith.constant 0 : index
    %16 = vector.load %arg1[%15, %c0_14, %c0_15] : memref<8x2x16xf32, #tpu.memory_space<vmem>>, vector<1x2x16xf32>
    %17 = vector.shape_cast %16 : vector<1x2x16xf32> to vector<2x16xf32>
    %cst = arith.constant dense<0.000000e+00> : vector<2x48xf32>
    %18 = tpu.matmul %17, %4, %cst {dimension_numbers = #tpu.dot_dimension_numbers<[1], [0], [0], [1], [0, 0, 1, 1], [], []>} : vector<2x16xf32>, vector<16x48xf32>, vector<2x48xf32> -> vector<2x48xf32>
    %19 = vector.broadcast %8 : vector<1x48xf32> to vector<2x48xf32>
    %20 = arith.addf %18, %19 : vector<2x48xf32>
    %cst_16 = arith.constant dense<0.000000e+00> : vector<2x48xf32>
    %21 = tpu.matmul %12, %6, %cst_16 {dimension_numbers = #tpu.dot_dimension_numbers<[1], [0], [0], [1], [0, 0, 1, 1], [], []>} : vector<2x16xf32>, vector<16x48xf32>, vector<2x48xf32> -> vector<2x48xf32>
    %22 = vector.broadcast %10 : vector<1x48xf32> to vector<2x48xf32>
    %23 = arith.addf %21, %22 : vector<2x48xf32>
    %24 = vector.extract_strided_slice %20 {offsets = [0, 0], sizes = [2, 16], strides = [1, 1]} : vector<2x48xf32> to vector<2x16xf32>
    %25 = vector.extract_strided_slice %23 {offsets = [0, 0], sizes = [2, 16], strides = [1, 1]} : vector<2x48xf32> to vector<2x16xf32>
    %26 = arith.addf %24, %25 : vector<2x16xf32>
    %27 = arith.negf %26 : vector<2x16xf32>
    %28 = math.exp %27 : vector<2x16xf32>
    %cst_17 = arith.constant 1.000000e+00 : f32
    %29 = vector.broadcast %cst_17 : f32 to vector<2x16xf32>
    %30 = arith.addf %29, %28 : vector<2x16xf32>
    %31 = arith.divf %29, %30 : vector<2x16xf32>
    %32 = vector.extract_strided_slice %20 {offsets = [0, 16], sizes = [2, 16], strides = [1, 1]} : vector<2x48xf32> to vector<2x16xf32>
    %33 = vector.extract_strided_slice %23 {offsets = [0, 16], sizes = [2, 16], strides = [1, 1]} : vector<2x48xf32> to vector<2x16xf32>
    %34 = arith.addf %32, %33 : vector<2x16xf32>
    %35 = arith.negf %34 : vector<2x16xf32>
    %36 = math.exp %35 : vector<2x16xf32>
    %cst_18 = arith.constant 1.000000e+00 : f32
    %37 = vector.broadcast %cst_18 : f32 to vector<2x16xf32>
    %38 = arith.addf %37, %36 : vector<2x16xf32>
    %39 = arith.divf %37, %38 : vector<2x16xf32>
    %40 = vector.extract_strided_slice %20 {offsets = [0, 32], sizes = [2, 16], strides = [1, 1]} : vector<2x48xf32> to vector<2x16xf32>
    %41 = vector.extract_strided_slice %23 {offsets = [0, 32], sizes = [2, 16], strides = [1, 1]} : vector<2x48xf32> to vector<2x16xf32>
    %42 = arith.mulf %31, %41 : vector<2x16xf32>
    %43 = arith.addf %40, %42 : vector<2x16xf32>
    %44 = math.tanh %43 : vector<2x16xf32>
    %cst_19 = arith.constant 1.000000e+00 : f32
    %45 = vector.broadcast %cst_19 : f32 to vector<2x16xf32>
    %46 = arith.subf %45, %39 : vector<2x16xf32>
    %47 = arith.mulf %46, %44 : vector<2x16xf32>
    %48 = arith.mulf %39, %12 : vector<2x16xf32>
    %49 = arith.addf %47, %48 : vector<2x16xf32>
    %c0_20 = arith.constant 0 : index
    %50 = arith.index_cast %14 : i32 to index
    %c0_21 = arith.constant 0 : index
    %c0_22 = arith.constant 0 : index
    %51 = vector.load %arg7[%c0_20, %50, %c0_21, %c0_22] : memref<1x8x2x16xf32, #tpu.memory_space<vmem>>, vector<1x1x2x16xf32>
    %52 = vector.shape_cast %51 : vector<1x1x2x16xf32> to vector<2x16xf32>
    %53 = vector.shape_cast %49 : vector<2x16xf32> to vector<1x1x2x16xf32>
    tpu.vector_store %arg7[%c0_20, %50, %c0_21, %c0_22], %53 {strides = array<i32>} : memref<1x8x2x16xf32, #tpu.memory_space<vmem>>, vector<1x1x2x16xf32>,
    %c1_i32_23 = arith.constant 1 : i32
    %54 = arith.muli %2, %c1_i32_23 : i32
    %55 = arith.addi %0, %54 : i32
    %56 = arith.index_cast %55 : i32 to index
    %c0_24 = arith.constant 0 : index
    %c0_25 = arith.constant 0 : index
    %57 = vector.load %arg1[%56, %c0_24, %c0_25] : memref<8x2x16xf32, #tpu.memory_space<vmem>>, vector<1x2x16xf32>
    %58 = vector.shape_cast %57 : vector<1x2x16xf32> to vector<2x16xf32>
    %cst_26 = arith.constant dense<0.000000e+00> : vector<2x48xf32>
    %59 = tpu.matmul %58, %4, %cst_26 {dimension_numbers = #tpu.dot_dimension_numbers<[1], [0], [0], [1], [0, 0, 1, 1], [], []>} : vector<2x16xf32>, vector<16x48xf32>, vector<2x48xf32> -> vector<2x48xf32>
    %60 = vector.broadcast %8 : vector<1x48xf32> to vector<2x48xf32>
    %61 = arith.addf %59, %60 : vector<2x48xf32>
    %cst_27 = arith.constant dense<0.000000e+00> : vector<2x48xf32>
    %62 = tpu.matmul %49, %6, %cst_27 {dimension_numbers = #tpu.dot_dimension_numbers<[1], [0], [0], [1], [0, 0, 1, 1], [], []>} : vector<2x16xf32>, vector<16x48xf32>, vector<2x48xf32> -> vector<2x48xf32>
    %63 = vector.broadcast %10 : vector<1x48xf32> to vector<2x48xf32>
    %64 = arith.addf %62, %63 : vector<2x48xf32>
    %65 = vector.extract_strided_slice %61 {offsets = [0, 0], sizes = [2, 16], strides = [1, 1]} : vector<2x48xf32> to vector<2x16xf32>
    %66 = vector.extract_strided_slice %64 {offsets = [0, 0], sizes = [2, 16], strides = [1, 1]} : vector<2x48xf32> to vector<2x16xf32>
    %67 = arith.addf %65, %66 : vector<2x16xf32>
    %68 = arith.negf %67 : vector<2x16xf32>
    %69 = math.exp %68 : vector<2x16xf32>
    %cst_28 = arith.constant 1.000000e+00 : f32
    %70 = vector.broadcast %cst_28 : f32 to vector<2x16xf32>
    %71 = arith.addf %70, %69 : vector<2x16xf32>
    %72 = arith.divf %70, %71 : vector<2x16xf32>
    %73 = vector.extract_strided_slice %61 {offsets = [0, 16], sizes = [2, 16], strides = [1, 1]} : vector<2x48xf32> to vector<2x16xf32>
    %74 = vector.extract_strided_slice %64 {offsets = [0, 16], sizes = [2, 16], strides = [1, 1]} : vector<2x48xf32> to vector<2x16xf32>
    %75 = arith.addf %73, %74 : vector<2x16xf32>
    %76 = arith.negf %75 : vector<2x16xf32>
    %77 = math.exp %76 : vector<2x16xf32>
    %cst_29 = arith.constant 1.000000e+00 : f32
    %78 = vector.broadcast %cst_29 : f32 to vector<2x16xf32>
    %79 = arith.addf %78, %77 : vector<2x16xf32>
    %80 = arith.divf %78, %79 : vector<2x16xf32>
    %81 = vector.extract_strided_slice %61 {offsets = [0, 32], sizes = [2, 16], strides = [1, 1]} : vector<2x48xf32> to vector<2x16xf32>
    %82 = vector.extract_strided_slice %64 {offsets = [0, 32], sizes = [2, 16], strides = [1, 1]} : vector<2x48xf32> to vector<2x16xf32>
    %83 = arith.mulf %72, %82 : vector<2x16xf32>
    %84 = arith.addf %81, %83 : vector<2x16xf32>
    %85 = math.tanh %84 : vector<2x16xf32>
    %cst_30 = arith.constant 1.000000e+00 : f32
    %86 = vector.broadcast %cst_30 : f32 to vector<2x16xf32>
    %87 = arith.subf %86, %80 : vector<2x16xf32>
    %88 = arith.mulf %87, %85 : vector<2x16xf32>
    %89 = arith.mulf %80, %49 : vector<2x16xf32>
    %90 = arith.addf %88, %89 : vector<2x16xf32>
    %c0_31 = arith.constant 0 : index
    %91 = arith.index_cast %55 : i32 to index
    %c0_32 = arith.constant 0 : index
    %c0_33 = arith.constant 0 : index
    %92 = vector.load %arg7[%c0_31, %91, %c0_32, %c0_33] : memref<1x8x2x16xf32, #tpu.memory_space<vmem>>, vector<1x1x2x16xf32>
    %93 = vector.shape_cast %92 : vector<1x1x2x16xf32> to vector<2x16xf32>
    %94 = vector.shape_cast %90 : vector<2x16xf32> to vector<1x1x2x16xf32>
    tpu.vector_store %arg7[%c0_31, %91, %c0_32, %c0_33], %94 {strides = array<i32>} : memref<1x8x2x16xf32, #tpu.memory_space<vmem>>, vector<1x1x2x16xf32>,
    %c2_i32_34 = arith.constant 2 : i32
    %95 = arith.muli %2, %c2_i32_34 : i32
    %96 = arith.addi %0, %95 : i32
    %97 = arith.index_cast %96 : i32 to index
    %c0_35 = arith.constant 0 : index
    %c0_36 = arith.constant 0 : index
    %98 = vector.load %arg1[%97, %c0_35, %c0_36] : memref<8x2x16xf32, #tpu.memory_space<vmem>>, vector<1x2x16xf32>
    %99 = vector.shape_cast %98 : vector<1x2x16xf32> to vector<2x16xf32>
    %cst_37 = arith.constant dense<0.000000e+00> : vector<2x48xf32>
    %100 = tpu.matmul %99, %4, %cst_37 {dimension_numbers = #tpu.dot_dimension_numbers<[1], [0], [0], [1], [0, 0, 1, 1], [], []>} : vector<2x16xf32>, vector<16x48xf32>, vector<2x48xf32> -> vector<2x48xf32>
    %101 = vector.broadcast %8 : vector<1x48xf32> to vector<2x48xf32>
    %102 = arith.addf %100, %101 : vector<2x48xf32>
    %cst_38 = arith.constant dense<0.000000e+00> : vector<2x48xf32>
    %103 = tpu.matmul %90, %6, %cst_38 {dimension_numbers = #tpu.dot_dimension_numbers<[1], [0], [0], [1], [0, 0, 1, 1], [], []>} : vector<2x16xf32>, vector<16x48xf32>, vector<2x48xf32> -> vector<2x48xf32>
    %104 = vector.broadcast %10 : vector<1x48xf32> to vector<2x48xf32>
    %105 = arith.addf %103, %104 : vector<2x48xf32>
    %106 = vector.extract_strided_slice %102 {offsets = [0, 0], sizes = [2, 16], strides = [1, 1]} : vector<2x48xf32> to vector<2x16xf32>
    %107 = vector.extract_strided_slice %105 {offsets = [0, 0], sizes = [2, 16], strides = [1, 1]} : vector<2x48xf32> to vector<2x16xf32>
    %108 = arith.addf %106, %107 : vector<2x16xf32>
    %109 = arith.negf %108 : vector<2x16xf32>
    %110 = math.exp %109 : vector<2x16xf32>
    %cst_39 = arith.constant 1.000000e+00 : f32
    %111 = vector.broadcast %cst_39 : f32 to vector<2x16xf32>
    %112 = arith.addf %111, %110 : vector<2x16xf32>
    %113 = arith.divf %111, %112 : vector<2x16xf32>
    %114 = vector.extract_strided_slice %102 {offsets = [0, 16], sizes = [2, 16], strides = [1, 1]} : vector<2x48xf32> to vector<2x16xf32>
    %115 = vector.extract_strided_slice %105 {offsets = [0, 16], sizes = [2, 16], strides = [1, 1]} : vector<2x48xf32> to vector<2x16xf32>
    %116 = arith.addf %114, %115 : vector<2x16xf32>
    %117 = arith.negf %116 : vector<2x16xf32>
    %118 = math.exp %117 : vector<2x16xf32>
    %cst_40 = arith.constant 1.000000e+00 : f32
    %119 = vector.broadcast %cst_40 : f32 to vector<2x16xf32>
    %120 = arith.addf %119, %118 : vector<2x16xf32>
    %121 = arith.divf %119, %120 : vector<2x16xf32>
    %122 = vector.extract_strided_slice %102 {offsets = [0, 32], sizes = [2, 16], strides = [1, 1]} : vector<2x48xf32> to vector<2x16xf32>
    %123 = vector.extract_strided_slice %105 {offsets = [0, 32], sizes = [2, 16], strides = [1, 1]} : vector<2x48xf32> to vector<2x16xf32>
    %124 = arith.mulf %113, %123 : vector<2x16xf32>
    %125 = arith.addf %122, %124 : vector<2x16xf32>
    %126 = math.tanh %125 : vector<2x16xf32>
    %cst_41 = arith.constant 1.000000e+00 : f32
    %127 = vector.broadcast %cst_41 : f32 to vector<2x16xf32>
    %128 = arith.subf %127, %121 : vector<2x16xf32>
    %129 = arith.mulf %128, %126 : vector<2x16xf32>
    %130 = arith.mulf %121, %90 : vector<2x16xf32>
    %131 = arith.addf %129, %130 : vector<2x16xf32>
    %c0_42 = arith.constant 0 : index
    %132 = arith.index_cast %96 : i32 to index
    %c0_43 = arith.constant 0 : index
    %c0_44 = arith.constant 0 : index
    %133 = vector.load %arg7[%c0_42, %132, %c0_43, %c0_44] : memref<1x8x2x16xf32, #tpu.memory_space<vmem>>, vector<1x1x2x16xf32>
    %134 = vector.shape_cast %133 : vector<1x1x2x16xf32> to vector<2x16xf32>
    %135 = vector.shape_cast %131 : vector<2x16xf32> to vector<1x1x2x16xf32>
    tpu.vector_store %arg7[%c0_42, %132, %c0_43, %c0_44], %135 {strides = array<i32>} : memref<1x8x2x16xf32, #tpu.memory_space<vmem>>, vector<1x1x2x16xf32>,
    %c3_i32 = arith.constant 3 : i32
    %136 = arith.muli %2, %c3_i32 : i32
    %137 = arith.addi %0, %136 : i32
    %138 = arith.index_cast %137 : i32 to index
    %c0_45 = arith.constant 0 : index
    %c0_46 = arith.constant 0 : index
    %139 = vector.load %arg1[%138, %c0_45, %c0_46] : memref<8x2x16xf32, #tpu.memory_space<vmem>>, vector<1x2x16xf32>
    %140 = vector.shape_cast %139 : vector<1x2x16xf32> to vector<2x16xf32>
    %cst_47 = arith.constant dense<0.000000e+00> : vector<2x48xf32>
    %141 = tpu.matmul %140, %4, %cst_47 {dimension_numbers = #tpu.dot_dimension_numbers<[1], [0], [0], [1], [0, 0, 1, 1], [], []>} : vector<2x16xf32>, vector<16x48xf32>, vector<2x48xf32> -> vector<2x48xf32>
    %142 = vector.broadcast %8 : vector<1x48xf32> to vector<2x48xf32>
    %143 = arith.addf %141, %142 : vector<2x48xf32>
    %cst_48 = arith.constant dense<0.000000e+00> : vector<2x48xf32>
    %144 = tpu.matmul %131, %6, %cst_48 {dimension_numbers = #tpu.dot_dimension_numbers<[1], [0], [0], [1], [0, 0, 1, 1], [], []>} : vector<2x16xf32>, vector<16x48xf32>, vector<2x48xf32> -> vector<2x48xf32>
    %145 = vector.broadcast %10 : vector<1x48xf32> to vector<2x48xf32>
    %146 = arith.addf %144, %145 : vector<2x48xf32>
    %147 = vector.extract_strided_slice %143 {offsets = [0, 0], sizes = [2, 16], strides = [1, 1]} : vector<2x48xf32> to vector<2x16xf32>
    %148 = vector.extract_strided_slice %146 {offsets = [0, 0], sizes = [2, 16], strides = [1, 1]} : vector<2x48xf32> to vector<2x16xf32>
    %149 = arith.addf %147, %148 : vector<2x16xf32>
    %150 = arith.negf %149 : vector<2x16xf32>
    %151 = math.exp %150 : vector<2x16xf32>
    %cst_49 = arith.constant 1.000000e+00 : f32
    %152 = vector.broadcast %cst_49 : f32 to vector<2x16xf32>
    %153 = arith.addf %152, %151 : vector<2x16xf32>
    %154 = arith.divf %152, %153 : vector<2x16xf32>
    %155 = vector.extract_strided_slice %143 {offsets = [0, 16], sizes = [2, 16], strides = [1, 1]} : vector<2x48xf32> to vector<2x16xf32>
    %156 = vector.extract_strided_slice %146 {offsets = [0, 16], sizes = [2, 16], strides = [1, 1]} : vector<2x48xf32> to vector<2x16xf32>
    %157 = arith.addf %155, %156 : vector<2x16xf32>
    %158 = arith.negf %157 : vector<2x16xf32>
    %159 = math.exp %158 : vector<2x16xf32>
    %cst_50 = arith.constant 1.000000e+00 : f32
    %160 = vector.broadcast %cst_50 : f32 to vector<2x16xf32>
    %161 = arith.addf %160, %159 : vector<2x16xf32>
    %162 = arith.divf %160, %161 : vector<2x16xf32>
    %163 = vector.extract_strided_slice %143 {offsets = [0, 32], sizes = [2, 16], strides = [1, 1]} : vector<2x48xf32> to vector<2x16xf32>
    %164 = vector.extract_strided_slice %146 {offsets = [0, 32], sizes = [2, 16], strides = [1, 1]} : vector<2x48xf32> to vector<2x16xf32>
    %165 = arith.mulf %154, %164 : vector<2x16xf32>
    %166 = arith.addf %163, %165 : vector<2x16xf32>
    %167 = math.tanh %166 : vector<2x16xf32>
    %cst_51 = arith.constant 1.000000e+00 : f32
    %168 = vector.broadcast %cst_51 : f32 to vector<2x16xf32>
    %169 = arith.subf %168, %162 : vector<2x16xf32>
    %170 = arith.mulf %169, %167 : vector<2x16xf32>
    %171 = arith.mulf %162, %131 : vector<2x16xf32>
    %172 = arith.addf %170, %171 : vector<2x16xf32>
    %c0_52 = arith.constant 0 : index
    %173 = arith.index_cast %137 : i32 to index
    %c0_53 = arith.constant 0 : index
    %c0_54 = arith.constant 0 : index
    %174 = vector.load %arg7[%c0_52, %173, %c0_53, %c0_54] : memref<1x8x2x16xf32, #tpu.memory_space<vmem>>, vector<1x1x2x16xf32>
    %175 = vector.shape_cast %174 : vector<1x1x2x16xf32> to vector<2x16xf32>
    %176 = vector.shape_cast %172 : vector<2x16xf32> to vector<1x1x2x16xf32>
    tpu.vector_store %arg7[%c0_52, %173, %c0_53, %c0_54], %176 {strides = array<i32>} : memref<1x8x2x16xf32, #tpu.memory_space<vmem>>, vector<1x1x2x16xf32>,
    %c4_i32 = arith.constant 4 : i32
    %177 = arith.muli %2, %c4_i32 : i32
    %178 = arith.addi %0, %177 : i32
    %179 = arith.index_cast %178 : i32 to index
    %c0_55 = arith.constant 0 : index
    %c0_56 = arith.constant 0 : index
    %180 = vector.load %arg1[%179, %c0_55, %c0_56] : memref<8x2x16xf32, #tpu.memory_space<vmem>>, vector<1x2x16xf32>
    %181 = vector.shape_cast %180 : vector<1x2x16xf32> to vector<2x16xf32>
    %cst_57 = arith.constant dense<0.000000e+00> : vector<2x48xf32>
    %182 = tpu.matmul %181, %4, %cst_57 {dimension_numbers = #tpu.dot_dimension_numbers<[1], [0], [0], [1], [0, 0, 1, 1], [], []>} : vector<2x16xf32>, vector<16x48xf32>, vector<2x48xf32> -> vector<2x48xf32>
    %183 = vector.broadcast %8 : vector<1x48xf32> to vector<2x48xf32>
    %184 = arith.addf %182, %183 : vector<2x48xf32>
    %cst_58 = arith.constant dense<0.000000e+00> : vector<2x48xf32>
    %185 = tpu.matmul %172, %6, %cst_58 {dimension_numbers = #tpu.dot_dimension_numbers<[1], [0], [0], [1], [0, 0, 1, 1], [], []>} : vector<2x16xf32>, vector<16x48xf32>, vector<2x48xf32> -> vector<2x48xf32>
    %186 = vector.broadcast %10 : vector<1x48xf32> to vector<2x48xf32>
    %187 = arith.addf %185, %186 : vector<2x48xf32>
    %188 = vector.extract_strided_slice %184 {offsets = [0, 0], sizes = [2, 16], strides = [1, 1]} : vector<2x48xf32> to vector<2x16xf32>
    %189 = vector.extract_strided_slice %187 {offsets = [0, 0], sizes = [2, 16], strides = [1, 1]} : vector<2x48xf32> to vector<2x16xf32>
    %190 = arith.addf %188, %189 : vector<2x16xf32>
    %191 = arith.negf %190 : vector<2x16xf32>
    %192 = math.exp %191 : vector<2x16xf32>
    %cst_59 = arith.constant 1.000000e+00 : f32
    %193 = vector.broadcast %cst_59 : f32 to vector<2x16xf32>
    %194 = arith.addf %193, %192 : vector<2x16xf32>
    %195 = arith.divf %193, %194 : vector<2x16xf32>
    %196 = vector.extract_strided_slice %184 {offsets = [0, 16], sizes = [2, 16], strides = [1, 1]} : vector<2x48xf32> to vector<2x16xf32>
    %197 = vector.extract_strided_slice %187 {offsets = [0, 16], sizes = [2, 16], strides = [1, 1]} : vector<2x48xf32> to vector<2x16xf32>
    %198 = arith.addf %196, %197 : vector<2x16xf32>
    %199 = arith.negf %198 : vector<2x16xf32>
    %200 = math.exp %199 : vector<2x16xf32>
    %cst_60 = arith.constant 1.000000e+00 : f32
    %201 = vector.broadcast %cst_60 : f32 to vector<2x16xf32>
    %202 = arith.addf %201, %200 : vector<2x16xf32>
    %203 = arith.divf %201, %202 : vector<2x16xf32>
    %204 = vector.extract_strided_slice %184 {offsets = [0, 32], sizes = [2, 16], strides = [1, 1]} : vector<2x48xf32> to vector<2x16xf32>
    %205 = vector.extract_strided_slice %187 {offsets = [0, 32], sizes = [2, 16], strides = [1, 1]} : vector<2x48xf32> to vector<2x16xf32>
    %206 = arith.mulf %195, %205 : vector<2x16xf32>
    %207 = arith.addf %204, %206 : vector<2x16xf32>
    %208 = math.tanh %207 : vector<2x16xf32>
    %cst_61 = arith.constant 1.000000e+00 : f32
    %209 = vector.broadcast %cst_61 : f32 to vector<2x16xf32>
    %210 = arith.subf %209, %203 : vector<2x16xf32>
    %211 = arith.mulf %210, %208 : vector<2x16xf32>
    %212 = arith.mulf %203, %172 : vector<2x16xf32>
    %213 = arith.addf %211, %212 : vector<2x16xf32>
    %c0_62 = arith.constant 0 : index
    %214 = arith.index_cast %178 : i32 to index
    %c0_63 = arith.constant 0 : index
    %c0_64 = arith.constant 0 : index
    %215 = vector.load %arg7[%c0_62, %214, %c0_63, %c0_64] : memref<1x8x2x16xf32, #tpu.memory_space<vmem>>, vector<1x1x2x16xf32>
    %216 = vector.shape_cast %215 : vector<1x1x2x16xf32> to vector<2x16xf32>
    %217 = vector.shape_cast %213 : vector<2x16xf32> to vector<1x1x2x16xf32>
    tpu.vector_store %arg7[%c0_62, %214, %c0_63, %c0_64], %217 {strides = array<i32>} : memref<1x8x2x16xf32, #tpu.memory_space<vmem>>, vector<1x1x2x16xf32>,
    %c5_i32 = arith.constant 5 : i32
    %218 = arith.muli %2, %c5_i32 : i32
    %219 = arith.addi %0, %218 : i32
    %220 = arith.index_cast %219 : i32 to index
    %c0_65 = arith.constant 0 : index
    %c0_66 = arith.constant 0 : index
    %221 = vector.load %arg1[%220, %c0_65, %c0_66] : memref<8x2x16xf32, #tpu.memory_space<vmem>>, vector<1x2x16xf32>
    %222 = vector.shape_cast %221 : vector<1x2x16xf32> to vector<2x16xf32>
    %cst_67 = arith.constant dense<0.000000e+00> : vector<2x48xf32>
    %223 = tpu.matmul %222, %4, %cst_67 {dimension_numbers = #tpu.dot_dimension_numbers<[1], [0], [0], [1], [0, 0, 1, 1], [], []>} : vector<2x16xf32>, vector<16x48xf32>, vector<2x48xf32> -> vector<2x48xf32>
    %224 = vector.broadcast %8 : vector<1x48xf32> to vector<2x48xf32>
    %225 = arith.addf %223, %224 : vector<2x48xf32>
    %cst_68 = arith.constant dense<0.000000e+00> : vector<2x48xf32>
    %226 = tpu.matmul %213, %6, %cst_68 {dimension_numbers = #tpu.dot_dimension_numbers<[1], [0], [0], [1], [0, 0, 1, 1], [], []>} : vector<2x16xf32>, vector<16x48xf32>, vector<2x48xf32> -> vector<2x48xf32>
    %227 = vector.broadcast %10 : vector<1x48xf32> to vector<2x48xf32>
    %228 = arith.addf %226, %227 : vector<2x48xf32>
    %229 = vector.extract_strided_slice %225 {offsets = [0, 0], sizes = [2, 16], strides = [1, 1]} : vector<2x48xf32> to vector<2x16xf32>
    %230 = vector.extract_strided_slice %228 {offsets = [0, 0], sizes = [2, 16], strides = [1, 1]} : vector<2x48xf32> to vector<2x16xf32>
    %231 = arith.addf %229, %230 : vector<2x16xf32>
    %232 = arith.negf %231 : vector<2x16xf32>
    %233 = math.exp %232 : vector<2x16xf32>
    %cst_69 = arith.constant 1.000000e+00 : f32
    %234 = vector.broadcast %cst_69 : f32 to vector<2x16xf32>
    %235 = arith.addf %234, %233 : vector<2x16xf32>
    %236 = arith.divf %234, %235 : vector<2x16xf32>
    %237 = vector.extract_strided_slice %225 {offsets = [0, 16], sizes = [2, 16], strides = [1, 1]} : vector<2x48xf32> to vector<2x16xf32>
    %238 = vector.extract_strided_slice %228 {offsets = [0, 16], sizes = [2, 16], strides = [1, 1]} : vector<2x48xf32> to vector<2x16xf32>
    %239 = arith.addf %237, %238 : vector<2x16xf32>
    %240 = arith.negf %239 : vector<2x16xf32>
    %241 = math.exp %240 : vector<2x16xf32>
    %cst_70 = arith.constant 1.000000e+00 : f32
    %242 = vector.broadcast %cst_70 : f32 to vector<2x16xf32>
    %243 = arith.addf %242, %241 : vector<2x16xf32>
    %244 = arith.divf %242, %243 : vector<2x16xf32>
    %245 = vector.extract_strided_slice %225 {offsets = [0, 32], sizes = [2, 16], strides = [1, 1]} : vector<2x48xf32> to vector<2x16xf32>
    %246 = vector.extract_strided_slice %228 {offsets = [0, 32], sizes = [2, 16], strides = [1, 1]} : vector<2x48xf32> to vector<2x16xf32>
    %247 = arith.mulf %236, %246 : vector<2x16xf32>
    %248 = arith.addf %245, %247 : vector<2x16xf32>
    %249 = math.tanh %248 : vector<2x16xf32>
    %cst_71 = arith.constant 1.000000e+00 : f32
    %250 = vector.broadcast %cst_71 : f32 to vector<2x16xf32>
    %251 = arith.subf %250, %244 : vector<2x16xf32>
    %252 = arith.mulf %251, %249 : vector<2x16xf32>
    %253 = arith.mulf %244, %213 : vector<2x16xf32>
    %254 = arith.addf %252, %253 : vector<2x16xf32>
    %c0_72 = arith.constant 0 : index
    %255 = arith.index_cast %219 : i32 to index
    %c0_73 = arith.constant 0 : index
    %c0_74 = arith.constant 0 : index
    %256 = vector.load %arg7[%c0_72, %255, %c0_73, %c0_74] : memref<1x8x2x16xf32, #tpu.memory_space<vmem>>, vector<1x1x2x16xf32>
    %257 = vector.shape_cast %256 : vector<1x1x2x16xf32> to vector<2x16xf32>
    %258 = vector.shape_cast %254 : vector<2x16xf32> to vector<1x1x2x16xf32>
    tpu.vector_store %arg7[%c0_72, %255, %c0_73, %c0_74], %258 {strides = array<i32>} : memref<1x8x2x16xf32, #tpu.memory_space<vmem>>, vector<1x1x2x16xf32>,
    %c6_i32 = arith.constant 6 : i32
    %259 = arith.muli %2, %c6_i32 : i32
    %260 = arith.addi %0, %259 : i32
    %261 = arith.index_cast %260 : i32 to index
    %c0_75 = arith.constant 0 : index
    %c0_76 = arith.constant 0 : index
    %262 = vector.load %arg1[%261, %c0_75, %c0_76] : memref<8x2x16xf32, #tpu.memory_space<vmem>>, vector<1x2x16xf32>
    %263 = vector.shape_cast %262 : vector<1x2x16xf32> to vector<2x16xf32>
    %cst_77 = arith.constant dense<0.000000e+00> : vector<2x48xf32>
    %264 = tpu.matmul %263, %4, %cst_77 {dimension_numbers = #tpu.dot_dimension_numbers<[1], [0], [0], [1], [0, 0, 1, 1], [], []>} : vector<2x16xf32>, vector<16x48xf32>, vector<2x48xf32> -> vector<2x48xf32>
    %265 = vector.broadcast %8 : vector<1x48xf32> to vector<2x48xf32>
    %266 = arith.addf %264, %265 : vector<2x48xf32>
    %cst_78 = arith.constant dense<0.000000e+00> : vector<2x48xf32>
    %267 = tpu.matmul %254, %6, %cst_78 {dimension_numbers = #tpu.dot_dimension_numbers<[1], [0], [0], [1], [0, 0, 1, 1], [], []>} : vector<2x16xf32>, vector<16x48xf32>, vector<2x48xf32> -> vector<2x48xf32>
    %268 = vector.broadcast %10 : vector<1x48xf32> to vector<2x48xf32>
    %269 = arith.addf %267, %268 : vector<2x48xf32>
    %270 = vector.extract_strided_slice %266 {offsets = [0, 0], sizes = [2, 16], strides = [1, 1]} : vector<2x48xf32> to vector<2x16xf32>
    %271 = vector.extract_strided_slice %269 {offsets = [0, 0], sizes = [2, 16], strides = [1, 1]} : vector<2x48xf32> to vector<2x16xf32>
    %272 = arith.addf %270, %271 : vector<2x16xf32>
    %273 = arith.negf %272 : vector<2x16xf32>
    %274 = math.exp %273 : vector<2x16xf32>
    %cst_79 = arith.constant 1.000000e+00 : f32
    %275 = vector.broadcast %cst_79 : f32 to vector<2x16xf32>
    %276 = arith.addf %275, %274 : vector<2x16xf32>
    %277 = arith.divf %275, %276 : vector<2x16xf32>
    %278 = vector.extract_strided_slice %266 {offsets = [0, 16], sizes = [2, 16], strides = [1, 1]} : vector<2x48xf32> to vector<2x16xf32>
    %279 = vector.extract_strided_slice %269 {offsets = [0, 16], sizes = [2, 16], strides = [1, 1]} : vector<2x48xf32> to vector<2x16xf32>
    %280 = arith.addf %278, %279 : vector<2x16xf32>
    %281 = arith.negf %280 : vector<2x16xf32>
    %282 = math.exp %281 : vector<2x16xf32>
    %cst_80 = arith.constant 1.000000e+00 : f32
    %283 = vector.broadcast %cst_80 : f32 to vector<2x16xf32>
    %284 = arith.addf %283, %282 : vector<2x16xf32>
    %285 = arith.divf %283, %284 : vector<2x16xf32>
    %286 = vector.extract_strided_slice %266 {offsets = [0, 32], sizes = [2, 16], strides = [1, 1]} : vector<2x48xf32> to vector<2x16xf32>
    %287 = vector.extract_strided_slice %269 {offsets = [0, 32], sizes = [2, 16], strides = [1, 1]} : vector<2x48xf32> to vector<2x16xf32>
    %288 = arith.mulf %277, %287 : vector<2x16xf32>
    %289 = arith.addf %286, %288 : vector<2x16xf32>
    %290 = math.tanh %289 : vector<2x16xf32>
    %cst_81 = arith.constant 1.000000e+00 : f32
    %291 = vector.broadcast %cst_81 : f32 to vector<2x16xf32>
    %292 = arith.subf %291, %285 : vector<2x16xf32>
    %293 = arith.mulf %292, %290 : vector<2x16xf32>
    %294 = arith.mulf %285, %254 : vector<2x16xf32>
    %295 = arith.addf %293, %294 : vector<2x16xf32>
    %c0_82 = arith.constant 0 : index
    %296 = arith.index_cast %260 : i32 to index
    %c0_83 = arith.constant 0 : index
    %c0_84 = arith.constant 0 : index
    %297 = vector.load %arg7[%c0_82, %296, %c0_83, %c0_84] : memref<1x8x2x16xf32, #tpu.memory_space<vmem>>, vector<1x1x2x16xf32>
    %298 = vector.shape_cast %297 : vector<1x1x2x16xf32> to vector<2x16xf32>
    %299 = vector.shape_cast %295 : vector<2x16xf32> to vector<1x1x2x16xf32>
    tpu.vector_store %arg7[%c0_82, %296, %c0_83, %c0_84], %299 {strides = array<i32>} : memref<1x8x2x16xf32, #tpu.memory_space<vmem>>, vector<1x1x2x16xf32>,
    %c7_i32_85 = arith.constant 7 : i32
    %300 = arith.muli %2, %c7_i32_85 : i32
    %301 = arith.addi %0, %300 : i32
    %302 = arith.index_cast %301 : i32 to index
    %c0_86 = arith.constant 0 : index
    %c0_87 = arith.constant 0 : index
    %303 = vector.load %arg1[%302, %c0_86, %c0_87] : memref<8x2x16xf32, #tpu.memory_space<vmem>>, vector<1x2x16xf32>
    %304 = vector.shape_cast %303 : vector<1x2x16xf32> to vector<2x16xf32>
    %cst_88 = arith.constant dense<0.000000e+00> : vector<2x48xf32>
    %305 = tpu.matmul %304, %4, %cst_88 {dimension_numbers = #tpu.dot_dimension_numbers<[1], [0], [0], [1], [0, 0, 1, 1], [], []>} : vector<2x16xf32>, vector<16x48xf32>, vector<2x48xf32> -> vector<2x48xf32>
    %306 = vector.broadcast %8 : vector<1x48xf32> to vector<2x48xf32>
    %307 = arith.addf %305, %306 : vector<2x48xf32>
    %cst_89 = arith.constant dense<0.000000e+00> : vector<2x48xf32>
    %308 = tpu.matmul %295, %6, %cst_89 {dimension_numbers = #tpu.dot_dimension_numbers<[1], [0], [0], [1], [0, 0, 1, 1], [], []>} : vector<2x16xf32>, vector<16x48xf32>, vector<2x48xf32> -> vector<2x48xf32>
    %309 = vector.broadcast %10 : vector<1x48xf32> to vector<2x48xf32>
    %310 = arith.addf %308, %309 : vector<2x48xf32>
    %311 = vector.extract_strided_slice %307 {offsets = [0, 0], sizes = [2, 16], strides = [1, 1]} : vector<2x48xf32> to vector<2x16xf32>
    %312 = vector.extract_strided_slice %310 {offsets = [0, 0], sizes = [2, 16], strides = [1, 1]} : vector<2x48xf32> to vector<2x16xf32>
    %313 = arith.addf %311, %312 : vector<2x16xf32>
    %314 = arith.negf %313 : vector<2x16xf32>
    %315 = math.exp %314 : vector<2x16xf32>
    %cst_90 = arith.constant 1.000000e+00 : f32
    %316 = vector.broadcast %cst_90 : f32 to vector<2x16xf32>
    %317 = arith.addf %316, %315 : vector<2x16xf32>
    %318 = arith.divf %316, %317 : vector<2x16xf32>
    %319 = vector.extract_strided_slice %307 {offsets = [0, 16], sizes = [2, 16], strides = [1, 1]} : vector<2x48xf32> to vector<2x16xf32>
    %320 = vector.extract_strided_slice %310 {offsets = [0, 16], sizes = [2, 16], strides = [1, 1]} : vector<2x48xf32> to vector<2x16xf32>
    %321 = arith.addf %319, %320 : vector<2x16xf32>
    %322 = arith.negf %321 : vector<2x16xf32>
    %323 = math.exp %322 : vector<2x16xf32>
    %cst_91 = arith.constant 1.000000e+00 : f32
    %324 = vector.broadcast %cst_91 : f32 to vector<2x16xf32>
    %325 = arith.addf %324, %323 : vector<2x16xf32>
    %326 = arith.divf %324, %325 : vector<2x16xf32>
    %327 = vector.extract_strided_slice %307 {offsets = [0, 32], sizes = [2, 16], strides = [1, 1]} : vector<2x48xf32> to vector<2x16xf32>
    %328 = vector.extract_strided_slice %310 {offsets = [0, 32], sizes = [2, 16], strides = [1, 1]} : vector<2x48xf32> to vector<2x16xf32>
    %329 = arith.mulf %318, %328 : vector<2x16xf32>
    %330 = arith.addf %327, %329 : vector<2x16xf32>
    %331 = math.tanh %330 : vector<2x16xf32>
    %cst_92 = arith.constant 1.000000e+00 : f32
    %332 = vector.broadcast %cst_92 : f32 to vector<2x16xf32>
    %333 = arith.subf %332, %326 : vector<2x16xf32>
    %334 = arith.mulf %333, %331 : vector<2x16xf32>
    %335 = arith.mulf %326, %295 : vector<2x16xf32>
    %336 = arith.addf %334, %335 : vector<2x16xf32>
    %c0_93 = arith.constant 0 : index
    %337 = arith.index_cast %301 : i32 to index
    %c0_94 = arith.constant 0 : index
    %c0_95 = arith.constant 0 : index
    %338 = vector.load %arg7[%c0_93, %337, %c0_94, %c0_95] : memref<1x8x2x16xf32, #tpu.memory_space<vmem>>, vector<1x1x2x16xf32>
    %339 = vector.shape_cast %338 : vector<1x1x2x16xf32> to vector<2x16xf32>
    %340 = vector.shape_cast %336 : vector<2x16xf32> to vector<1x1x2x16xf32>
    tpu.vector_store %arg7[%c0_93, %337, %c0_94, %c0_95], %340 {strides = array<i32>} : memref<1x8x2x16xf32, #tpu.memory_space<vmem>>, vector<1x1x2x16xf32>,
    return
  }
  func.func @transform_0(%arg0: i32) -> (i32, i32, i32) {
    %c0_i32 = arith.constant 0 : i32
    %c0_i32_0 = arith.constant 0 : i32
    %c0_i32_1 = arith.constant 0 : i32
    %c0_i32_2 = arith.constant 0 : i32
    return %c0_i32, %c0_i32_0, %c0_i32_1 : i32, i32, i32
  }
  func.func @transform_1(%arg0: i32) -> (i32, i32, i32) {
    %c0_i32 = arith.constant 0 : i32
    %c0_i32_0 = arith.constant 0 : i32
    %c0_i32_1 = arith.constant 0 : i32
    return %arg0, %c0_i32, %c0_i32_0 : i32, i32, i32
  }
  func.func @transform_2(%arg0: i32) -> (i32, i32, i32) {
    %c0_i32 = arith.constant 0 : i32
    %c0_i32_0 = arith.constant 0 : i32
    %c0_i32_1 = arith.constant 0 : i32
    return %arg0, %c0_i32, %c0_i32_0 : i32, i32, i32
  }
  func.func @transform_3(%arg0: i32) -> (i32, i32, i32) {
    %c0_i32 = arith.constant 0 : i32
    %c0_i32_0 = arith.constant 0 : i32
    %c0_i32_1 = arith.constant 0 : i32
    return %arg0, %c0_i32, %c0_i32_0 : i32, i32, i32
  }
  func.func @transform_4(%arg0: i32) -> (i32, i32, i32) {
    %c0_i32 = arith.constant 0 : i32
    %c0_i32_0 = arith.constant 0 : i32
    %c0_i32_1 = arith.constant 0 : i32
    return %arg0, %c0_i32, %c0_i32_0 : i32, i32, i32
  }
  func.func @transform_5(%arg0: i32) -> (i32, i32, i32) {
    %c0_i32 = arith.constant 0 : i32
    %c0_i32_0 = arith.constant 0 : i32
    %c0_i32_1 = arith.constant 0 : i32
    return %arg0, %c0_i32, %c0_i32_0 : i32, i32, i32
  }
  func.func @transform_6(%arg0: i32) -> (i32, i32, i32, i32) {
    %c0_i32 = arith.constant 0 : i32
    %c0_i32_0 = arith.constant 0 : i32
    %c0_i32_1 = arith.constant 0 : i32
    %c0_i32_2 = arith.constant 0 : i32
    return %arg0, %c0_i32, %c0_i32_0, %c0_i32_1 : i32, i32, i32, i32
  }
}

</mosaic_0001>

<bundles_post_ra>
// kernel: tpu_custom_call.1
= control target key start
LH: loop header
LB: loop body
LE: loop exit
PB: predicated region body
PF: predicated region fallthrough
CT: control target
= control target key end

     0   :  { %s3233_s0 = inlined_call_operand.hbm [shape: f32[8,2,16], index: 0, kind: input, shape index: {}]   ;;  %s3234_s1 = inlined_call_operand.hbm [shape: f32[2,2,16], index: 1, kind: input, shape index: {}]   ;;  %s3235_s2 = inlined_call_operand.hbm [shape: f32[2,16,48], index: 2, kind: input, shape index: {}]   ;;  %s3236_s3 = inlined_call_operand.hbm [shape: f32[2,16,48], index: 3, kind: input, shape index: {}]   ;;  %s3237_s4 = inlined_call_operand.vmem [shape: f32[2,1,48], index: 4, kind: input, shape index: {}]   ;;  %s3238_s5 = inlined_call_operand.vmem [shape: f32[2,1,48], index: 5, kind: input, shape index: {}]   ;;  %s3239_s6 = inlined_call_operand.hbm [shape: f32[2,8,2,16], index: 6, kind: output, shape index: {}]  }
   0x1   :  { %3251 = sst [smem:[#allocation17_spill]] %s3234_s1 }
   0x2   :  { %3252 = sst [smem:[#allocation18_spill]] %s3235_s2 }
   0x3   :  { %11 = vsyncpa [#allocation3], 0 }
   0x4   :  { %12 = vsyncpa [#allocation6], 0 }
   0x5   :  { %14 = vsyncpa [#allocation6 + $0x1], 0 }
   0x6   :  { %15 = vsyncpa [#allocation9], 0 }
   0x7   :  { %17 = vsyncpa [#allocation9 + $0x1], 0 }
   0x8   :  { %18 = vsyncpa [#allocation4], 0 }
   0x9   :  { %20 = vsyncpa [#allocation4 + $0x1], 0  ;;  %s2684_s21 = smov 0   ;;  %s2686_s22 = smov 0  }
   0xa   :  { %s2688_s23 = smov 0   ;;  %s2690_s24 = smov 0  }
   0xb LB: > { %3253 = sst [smem:[#allocation15_spill]] %s2627_s23  ;;  %s2705_s25 = sadd.s32 1, %s2631_s24   ;;  %s2631_s24 = sphi %s2690_s24, %s3281_s24   ;;  %s2627_s23 = sphi %s2688_s23, %s3278_s23   ;;  %s2623_s22 = sphi %s2686_s22, %s3280_s22   ;;  %s2619_s21 = sphi %s2684_s21, %s3279_s21  }
   0xc   : > { %s54_s26 = sadd.s32 1, %s2627_s23  ;;  %s51_s27 = ssub.s32 %s2631_s24, %s2705_s25 }
   0xd   : > { %p3240_p0 = scmp.ne.s32.totalorder %s2627_s23, %s2623_s22  ;;  %p52_p1 = scmp.eq.s32.totalorder %s51_s27, 0 }
   0xe   : > { %p62_p2 = scmp.eq.s32.totalorder %s2631_s24, 0  ;;  %p2354_p4 = scmp.lt.s32.totalorder %s2631_s24, 2 }
   0xf   : > { %s2716_s28 = scalar_select %p52_p1, %s2627_s23, %s54_s26  }
  0x10   : > { %p63_p5 = por %p62_p2, %p3240_p0  ;;  %s234_s29 = sand.u32 1, %s2631_s24  }
  0x11   : > { %3254 = sst [smem:[#allocation16_spill]] %s2716_s28  ;;  %s2723_s30 = sand.u32 1, %s2627_s23  }
  0x12   : > { %s2104_s7 = sshll.u32 %s2723_s30, 1  ;;  %s2105_s8 = sshll.u32 %s2631_s24, 5 }
  0x13   : > { %s3255_s1 = sld [smem:[#allocation17_spill]]  ;;  %s238_s12 = scalar_lea.vmem [#allocation5], %s2104_s7 }
  0x14   : > { %s245_s13 = sshll.u32 %s238_s12, 4  ;;  %p2732_p6 = pnand %p2354_p4, %p63_p5  ;;  %s246_s13 = int_to_ptr.vmem [resolvable:$true] %s245_s13 }
  0x15   : > { %s3241_s15 = sshll.u32 %s2723_s30, 4  ;;  %s2737_s16 = scalar_lea.sflag [#allocation6], %s234_s29 }
  0x16   : > { %p2743_p8 = pneg %p2732_p6 }
  0x19   : > { %s2730_s11 = scalar_lea.hbm %s3255_s1, %s2105_s8  ;;  %s2454_s26 = scalar_lea.hbm %s3255_s1, 64 }
  0x1a   : > { %s2449_s17 = scalar_lea.hbm %s2730_s11, 32  ;;  %p2455_p11 = scmp.lt.s32.totalorder %s2730_s11, %s3255_s1 }
  0x1b   : > { %p2450_p7 = scmp.ne.s32.totalorder %s2730_s11, %s2449_s17  ;;  %p2456_p12 = scmp.lt.s32.totalorder %s2454_s26, %s2449_s17 }
  0x1d   : > { %p2452_p9 = pnand %p2743_p8, %p2450_p7  ;;  %p2457_p13 = por %p2456_p12, %p2455_p11 }
  0x1f   : > { %p2453_p10 = pneg %p2452_p9 }
  0x21   : > { %p2458_p1 = pnand %p2457_p13, %p2453_p10 }
  0x23   : > { %2461 = shalt.err (!%p2458_p1)
}
  0x24   : > { %s2462_s29 = scalar_lea.vmem %s246_s13, 32  ;;  %s2633_s8 = smov [#allocation5]  }
  0x25   : > { %p2463_p2 = scmp.ne.s32.totalorder %s246_s13, %s2462_s29  ;;  %s2467_s9 = sshll.u32 %s2633_s8, 4  ;;  %s2468_s9 = int_to_ptr.vmem [resolvable:$false] %s2467_s9 }
  0x26   : > { %s2469_s10 = scalar_lea.vmem %s2468_s9, 64  ;;  %p2470_p7 = scmp.lt.s32.totalorder %s246_s13, %s2468_s9 }
  0x27   : > { %p2465_p4 = pnand %p2463_p2, %p2743_p8  ;;  %p2471_p9 = scmp.lt.s32.totalorder %s2469_s10, %s2462_s29 }
  0x29   : > { %p2466_p5 = pneg %p2465_p4  ;;  %p2472_p3 = por %p2471_p9, %p2470_p7 }
  0x2b   : > { %p2473_p0 = pnand %p2472_p3, %p2466_p5 }
  0x2d   : > { %2476 = shalt.err (!%p2473_p0)
}
  0x2e   : > { %2342 = dma.hbm_to_vmem [thread:$0]  (!%p2732_p6), %s2730_s11, 32, %s246_s13, %s2737_s16  }
  0x2f   : > { %s256_s12 = scalar_lea.vmem [#allocation7], %s3241_s15  ;;  %s2767_s19 = sadd.s32 4294967295, %s2631_s24  }
  0x30   : > { %s263_s17 = sshll.u32 %s256_s12, 4  ;;  %s2100_s20 = sadd.s32 4294967294, %s2631_s24   ;;  %s2764_s17 = int_to_ptr.vmem [resolvable:$true] %s263_s17 }
  0x31   : > { %p67_p0 = scmp.ne.s32.totalorder %s2623_s22, %s2619_s21  ;;  %p3245_p3 = scmp.eq.s32.totalorder %s2767_s19, 0 }
  0x32   : > { %p195_p10 = scmp.eq.s32.totalorder %s2767_s19, 1  ;;  %p201_p11 = scmp.eq.s32.totalorder %s2100_s20, 1 }
  0x33   : > { %p2776_p12 = por %p3245_p3, %p67_p0  ;;  %p2101_p13 = scmp.ge.s32.totalorder %s2631_s24, 1 }
  0x34   : > { %p3259_p1 = scmp.ne.s32.totalorder %s2627_s23, %s2623_s22  ;;  %p2788_p4 = por %p201_p11, %p67_p0 }
  0x35   : > { %s3258_s11 = scalar_select %p2776_p12, 1, 0 }
  0x36   : > { %p2784_p2 = por %p195_p10, %p3259_p1  ;;  %p208_p5 = scmp.lt.s32.totalorder %s2631_s24, 3 }
  0x37   : > { %s3261_s26 = scalar_select %p2788_p4, 1, 0 }
  0x38   : > { %s3260_s13 = scalar_select %p2784_p2, 1, 0 }
  0x39   : > { %p2793_p7 = pnand %p2101_p13, %p208_p5  ;;  %s2634_s7 = smov [#allocation2]  }
  0x3a   : > { %s220_s29 = sshll.u32 %s2634_s7, 4  ;;  %s3243_s8 = sshll.u32 %s2631_s24, 8  ;;  %s2797_s29 = int_to_ptr.vmem [resolvable:$true] %s220_s29 }
  0x3b   : > { %s3262_s27 = scalar_select %p2793_p7, 1, 0 }
  0x3c   : > { %p2335_p9 = pneg %p2793_p7  ;;  %s3263_s2 = sld [smem:[#allocation18_spill]] }
  0x3e   : > { %p2811_p0 = pnand %p2335_p9, %p3245_p3 }
  0x40   : > { %s3264_s20 = scalar_select %p2811_p0, 1, 0 }
  0x42   : > { %s2807_s12 = scalar_lea.hbm %s3263_s2, %s3243_s8  ;;  %s2482_s28 = scalar_lea.hbm %s3263_s2, 512 }
  0x43   : > { %s2477_s7 = scalar_lea.hbm %s2807_s12, 256  ;;  %p2483_p1 = scmp.lt.s32.totalorder %s2807_s12, %s3263_s2 }
  0x44   : > { %p2478_p10 = scmp.ne.s32.totalorder %s2807_s12, %s2477_s7  ;;  %p2484_p5 = scmp.lt.s32.totalorder %s2482_s28, %s2477_s7 }
  0x46   : > { %p2480_p11 = pnand %p2478_p10, %p2743_p8  ;;  %p2485_p4 = por %p2484_p5, %p2483_p1 }
  0x48   : > { %p2481_p13 = pneg %p2480_p11 }
  0x4a   : > { %p2486_p2 = pnand %p2485_p4, %p2481_p13 }
  0x4c   : > { %2489 = shalt.err (!%p2486_p2)
}
  0x4d   : > { %s2490_s8 = scalar_lea.vmem %s2764_s17, 256  ;;  %s2635_s23 = smov [#allocation7]  }
  0x4e   : > { %p2491_p9 = scmp.ne.s32.totalorder %s2764_s17, %s2490_s8  ;;  %s2495_s1 = sshll.u32 %s2635_s23, 4  ;;  %s2496_s1 = int_to_ptr.vmem [resolvable:$false] %s2495_s1 }
  0x4f   : > { %s2497_s15 = scalar_lea.vmem %s2496_s1, 512  ;;  %p2498_p3 = scmp.lt.s32.totalorder %s2764_s17, %s2496_s1 }
  0x50   : > { %p2493_p10 = pnand %p2491_p9, %p2743_p8  ;;  %p2499_p12 = scmp.lt.s32.totalorder %s2497_s15, %s2490_s8 }
  0x52   : > { %p2494_p11 = pneg %p2493_p10  ;;  %p2500_p7 = por %p2499_p12, %p2498_p3 }
  0x54   : > { %p2501_p0 = pnand %p2500_p7, %p2494_p11 }
  0x56   : > { %2504 = shalt.err (!%p2501_p0)
}
  0x57   : > { %s3249_s28 = smov 128   ;;  %s3250_s7 = smov 8  }
  0x58   : > { %2345 = dma.hbm_to_vmem [thread:$0]  (!%p2732_p6), %s2807_s12, 256, %s2764_s17, %s2737_s16, %s3249_s28, %s3249_s28, %s3250_s7  }
  0x59   : > { %p3265_p2 = scmp.ne.s32.totalorder %s3264_s20, 0  ;;  %s2516_s23 = scalar_lea.vmem %s2797_s29, 256 }
  0x5a   : > { %p2517_p3 = scmp.ne.s32.totalorder %s2797_s29, %s2516_s23  ;;  %p2524_p0 = scmp.lt.s32.totalorder %s2797_s29, %s2797_s29 }
  0x5b   : > { %p2507_p4 = pneg %p3265_p2  ;;  %p2525_p13 = scmp.lt.s32.totalorder %s2516_s23, %s2516_s23 }
  0x5d   : > { %p2519_p12 = pnand %p2517_p3, %p2507_p4  ;;  %p2526_p1 = por %p2525_p13, %p2524_p0 }
  0x5f   : > { %p2520_p7 = pneg %p2519_p12 }
  0x61   : > { %p2527_p5 = pnand %p2526_p1, %p2520_p7 }
  0x63   : > { %2530 = shalt.err (!%p2527_p5)
}
  0x64   : > { %s2638_s8 = smov 32   ;;  %s2639_s16 = smov 2  }
  0x65   : > { %2338 = dma.hbm_to_vmem [thread:$0]  (!%p3265_p2), %s3233_s0, 256, %s2797_s29, [#allocation3], %s2638_s8, %s2638_s8, %s2639_s16  }
  0x66   : > { %s3266_s9 = sshll.u32 %s2631_s24, 8  ;;  %s3267_s23 = sshll.u32 %s2723_s30, 4 }
  0x67   : > { %s2856_s15 = scalar_lea.hbm %s3236_s3, %s3266_s9  ;;  %s277_s28 = scalar_lea.vmem [#allocation8], %s3267_s23 }
  0x68   : > { %s284_s7 = sshll.u32 %s277_s28, 4  ;;  %s274_s2 = scalar_lea.sflag [#allocation9], %s2723_s30  ;;  %s2860_s7 = int_to_ptr.vmem [resolvable:$true] %s284_s7 }
  0x69   : > { %s2531_s20 = scalar_lea.hbm %s2856_s15, 256  ;;  %s2536_s16 = scalar_lea.hbm %s3236_s3, 512 }
  0x6a   : > { %p2532_p9 = scmp.ne.s32.totalorder %s2856_s15, %s2531_s20  ;;  %p2537_p2 = scmp.lt.s32.totalorder %s2856_s15, %s3236_s3 }
  0x6b   : > { %p2538_p4 = scmp.lt.s32.totalorder %s2536_s16, %s2531_s20 }
  0x6c   : > { %p2534_p10 = pnand %p2532_p9, %p2743_p8 }
  0x6d   : > { %p2539_p3 = por %p2538_p4, %p2537_p2 }
  0x6e   : > { %p2535_p11 = pneg %p2534_p10 }
  0x70   : > { %p2540_p12 = pnand %p2539_p3, %p2535_p11 }
  0x72   : > { %2543 = shalt.err (!%p2540_p12)
}
  0x73   : > { %s2544_s30 = scalar_lea.vmem %s2860_s7, 256  ;;  %s2640_s28 = smov [#allocation8]  }
  0x74   : > { %p2545_p7 = scmp.ne.s32.totalorder %s2860_s7, %s2544_s30  ;;  %s2549_s9 = sshll.u32 %s2640_s28, 4  ;;  %s2550_s9 = int_to_ptr.vmem [resolvable:$false] %s2549_s9 }
  0x75   : > { %s2551_s10 = scalar_lea.vmem %s2550_s9, 512  ;;  %p2552_p1 = scmp.lt.s32.totalorder %s2860_s7, %s2550_s9 }
  0x76   : > { %p2547_p0 = pnand %p2545_p7, %p2743_p8  ;;  %p2553_p5 = scmp.lt.s32.totalorder %s2551_s10, %s2544_s30 }
  0x78   : > { %p2548_p13 = pneg %p2547_p0  ;;  %p2554_p9 = por %p2553_p5, %p2552_p1 }
  0x7a   : > { %p2555_p10 = pnand %p2554_p9, %p2548_p13 }
  0x7c   : > { %2558 = shalt.err (!%p2555_p10)
}
  0x7d   : > { %s3268_s1 = smov 8   ;;  %s3269_s23 = smov 128  }
  0x7e   : > { %2348 = dma.hbm_to_vmem [thread:$0]  (!%p2732_p6), %s2856_s15, 256, %s2860_s7, %s274_s2, %s3269_s23, %s3269_s23, %s3268_s1  }
  0x7f   : > { %p3270_p8 = scmp.ne.s32.totalorder %s3262_s27, 0 }
  0x80   : > { %p3271_p11 = scmp.eq.s32.totalorder (!%p3270_p8), %s2767_s19, 0 }
  0x81   : > { %308 = sbr.rel (%p3270_p8) target bundleno = 5583 (0x15cf), region = 44 }
  0x86   : > { %2602 = dma.done.wait (%p3271_p11), [#allocation3], 256   ;;  %p3272_p2 = pmov %p3271_p11 }
  0x87   : > { %s314_s18 = sand.u32 1, %s2767_s19   ;;  %s2894_s14 = sand.u32 1, %s2623_s22  }
  0x88   : > { %2604 = vsyncadd (%p3272_p2), [#allocation3], 4294967040  ;;  %s2114_s20 = sshll.u32 %s2894_s14, 1  ;;  %s315_s29 = scalar_lea.sflag [#allocation6], %s314_s18 }
  0x89   : > { %s318_s8 = scalar_lea.vmem [#allocation5], %s2114_s20  ;;  %p3273_p6 = scmp.ne.s32.totalorder %s3258_s11, 0 }
  0x8b   : > { %2606 = dma.done.wait (%p3273_p6), %s315_s29, 288  }
  0x8c   : > { %2608 = vsyncadd (%p3273_p6), %s315_s29, 4294967008  ;;  %s2902_s2 = sshll.u32 %s2894_s14, 4  ;;  %s333_s7 = scalar_lea.sflag [#allocation9], %s2894_s14 }
  0x8d   : > { %s327_s27 = scalar_lea.vmem [#allocation7], %s2902_s2  ;;  %s336_s15 = scalar_lea.vmem [#allocation8], %s2902_s2 }
  0x8e   : > { %2610 = dma.done.wait (%p3273_p6), %s333_s7, 256  }
  0x8f   : > { %2612 = vsyncadd (%p3273_p6), %s333_s7, 4294967040  ;;  %v2641_v0 = vmov 0.0   ;;  %s2119_s16 = smul.u32 14, %s2767_s19  ;;  %vm2642_vm0 = vmmov 0   ;;  %v2918_v1 = vld [vmem:[%s327_s27 + $0x8] sm:$0xff]  ;;  %v2922_v3 = vld [vmem:[%s327_s27] sm:$0xff] }
  0x90   : > { %2211 = vmatprep.subr.mxu0 %v2641_v0  ;;  %2218 = vmatprep.subr.mxu1 %v2641_v0  ;;  %v2920_v2 = vld [vmem:[%s336_s15 + $0x8] sm:$0xff]  ;;  %v2926_v4 = vld [vmem:[%s336_s15] sm:$0xff]  ;;  %vm406_vm1 = vcmask 130048   ;;  %p381_p4 = scmp.lt.s32.totalorder %s2767_s19, 1  ;;  %s2643_s9 = smov 96   ;;  %vm593_vm2 = vcmask 123904  }
  0x91   : > { %2215 = vmatprep.mubr.msk.f32.mxu0 %vm2642_vm0, %v2641_v0  ;;  %2222 = vmatprep.mubr.msk.f32.mxu1 %vm2642_vm0, %v2641_v0  ;;  %s398_s11 = scalar_lea.vmem [#allocation2], %s2119_s16  ;;  %v396_v6 = vld [vmem:[%s318_s8] sm:$0x3]  ;;  %s2644_s18 = smov 32  }
  0x92   : > { %2212 = vmatpush3.msra.mxu0 %v2918_v1  ;;  %2219 = vmatpush3.msra.mxu1 %v2920_v2  ;;  %v399_v5 = vld [vmem:[%s398_s11] sm:$0x3]  ;;  %s382_s17 = scalar_select %p381_p4, %s2767_s19, 1 }
  0x93   : > { %2213 = vmatprep.subr.mxu0 %v2641_v0  ;;  %2220 = vmatprep.subr.mxu1 %v2641_v0  ;;  %s2645_s20 = smov 112   ;;  %s2646_s29 = smov 16  }
  0x94   : > { %2214 = vmatpush3.msra.mxu0 %v2922_v3  ;;  %2221 = vmatpush3.msra.mxu1 %v2926_v4  ;;  %s386_s28 = scalar_lea.vmem %s3238_s5, %s382_s17  ;;  %s383_s23 = scalar_lea.vmem %s3237_s4, %s382_s17 }
  0x95   : > { %2216 = vmatmul.mubr.msk.f32.vlgmr.msra.gmra.mxu0 %vm406_vm1, %v399_v5  ;;  %2223 = vmatmul.mubr.msk.f32.vlgmr.msra.gmra.mxu1 %vm406_vm1, %v396_v6  ;;  %v2955_v7 = vld [vmem:[%s386_s28] ss:$0 sm:$0xff]  ;;  %s2968_s8 = smul.u32 7, %s2767_s19  ;;  %s2118_s27 = sshll.u32 %s2767_s19, 1 }
  0x96   : > { %2232 = vmatprep.subr.mxu1 %v2641_v0  ;;  %2225 = vmatprep.subr.mxu0 %v2641_v0  ;;  %v2962_v13 = vld [vmem:[%s383_s23] ss:$0 sm:$0xff]  ;;  %s2971_s7 = ssub.s32 1, %s2118_s27  ;;  %s2987_s12 = scalar_lea.vmem [#allocation10], %s2902_s2 }
  0x97   : > { %2233 = vmatpush3.msra.mxu1 %v2920_v2  ;;  %2226 = vmatpush3.msra.mxu0 %v2918_v1  ;;  %s595_s15 = sadd.s32 %s2971_s7, %s2968_s8  ;;  %s592_s30 = scalar_lea.vmem %s2987_s12, %s2119_s16 [#allocation10] }
  0x98   : > { %2234 = vmatprep.subr.mxu1 %v2641_v0  ;;  %2227 = vmatprep.subr.mxu0 %v2641_v0  ;;  %s2975_s11 = sshll.u32 %s595_s15, 1  ;;  %s2129_s2 = sshll.u32 %s2971_s7, 1 }
  0x99   : > { %2235 = vmatpush3.msra.mxu1 %v2926_v4  ;;  %2228 = vmatpush3.msra.mxu0 %v2922_v3  ;;  %s597_s17 = scalar_lea.vmem [#allocation2], %s2975_s11  ;;  %s3007_s16 = sadd.s32 %s2129_s2, %s2968_s8 }
  0x9a   : > { %2229 = vmatprep.mubr.msk.f32.mxu0 %vm2642_vm0, %v2641_v0  ;;  %2236 = vmatprep.mubr.msk.f32.mxu1 %vm2642_vm0, %v2641_v0  ;;  %v598_v25 = vld [vmem:[%s597_s17] sm:$0x3]  ;;  %s2130_s28 = sshll.u32 %s3007_s16, 1  ;;  %s774_s1 = scalar_lea.vmem %s2987_s12, %s2975_s11 [#allocation10] }
  0x9b   : > { %2246 = vmatprep.subr.mxu1 %v2641_v0  ;;  %2239 = vmatprep.subr.mxu0 %v2641_v0  ;;  %s779_s10 = scalar_lea.vmem [#allocation2], %s2130_s28  ;;  %s958_s23 = smul.u32 3, %s2971_s7 }
  0x9c   : > { %2230 = vmatmul.mubr.msk.f32.vlgmr.msra.gmra.mxu0 %vm406_vm1, %v598_v25  ;;  %v780_v49 = vld [vmem:[%s779_s10] sm:$0x3]  ;;  %s956_s11 = scalar_lea.vmem %s2987_s12, %s2130_s28 [#allocation10]  ;;  %s2138_s17 = sshll.u32 %s2971_s7, 2 }
  0x9d   : > { %2240 = vmatpush3.msra.mxu0 %v2918_v1  ;;  %2243 = vmatprep.mubr.msk.f32.mxu0 %vm2642_vm0, %v2641_v0  ;;  %s1322_s10 = smul.u32 5, %s2971_s7  ;;  %p3274_p12 = scmp.ne.s32.totalorder %s3260_s13, 0 }
  0x9e   : > { %2241 = vmatprep.subr.mxu0 %v2641_v0 }
  0x9f   : > { %2242 = vmatpush3.msra.mxu0 %v2922_v3 }
  0xa0   : > { %2253 = vmatprep.subr.mxu0 %v2641_v0  ;;  %2244 = vmatmul.mubr.msk.f32.vlgmr.msra.gmra.mxu0 %vm406_vm1, %v780_v49 }
  0xa1   : > { %2254 = vmatpush3.msra.mxu0 %v2918_v1  ;;  %2257 = vmatprep.mubr.msk.f32.mxu0 %vm2642_vm0, %v2641_v0 }
  0xa2   : > { %2255 = vmatprep.subr.mxu0 %v2641_v0 }
  0xa3   : > { %2256 = vmatpush3.msra.mxu0 %v2922_v3 }
  0xa4   : > { %2267 = vmatprep.subr.mxu0 %v2641_v0 }
 0x155   : > { %v476_v8 = vpop.f32.mrf.mxu0  ;;  %v555_v9 = vpop.f32.mrf.mxu1 }
 0x156   : > { %v556_v10 = vadd.f32 %v2955_v7, %v555_v9  ;;  %v477_v14 = vadd.f32 %v2962_v13, %v476_v8 }
 0x157   : > { %v2224_v11 = vpop.f32.mrf.mxu1  ;;  %v2217_v12 = vpop.f32.mrf.mxu0 }
 0x158   : > { %567 = vrot.lane.b32.xlu0 %v556_v10, %s2643_s9  ;;  %v559_v15 = vadd.f32 %v556_v10, %v477_v14 }
 0x15a   : > { %v2124_v16 = vmul.f32 -1.442695, %v559_v15 }
 0x15c   : > { %2401 = vpow2.f32 %v2124_v16  ;;  %v668_v33 = vpop.f32.mrf.mxu0 }
 0x15d   : > { %v669_v38 = vadd.f32 %v2962_v13, %v668_v33 }
 0x15e   : > { %v2231_v34 = vpop.f32.mrf.mxu0 }
 0x160   : > { %v850_v56 = vpop.f32.mrf.mxu0 }
 0x161   : > { %v851_v61 = vadd.f32 %v2962_v13, %v850_v56 }
 0x162   : > { %v2245_v57 = vpop.f32.mrf.mxu0 }
 0x169   : > { %v2402_v17 = vpop.eup %2401 }
 0x16a   : > { %v563_v18 = vadd.f32 1.0, %v2402_v17 }
 0x16c   : > { %2403 = vrcp.f32 %v563_v18 }
 0x179   : > { %v2404_v19 = vpop.eup %2403 }
 0x17a   : > { %v577_v27 = vsub.f32 1.0, %v2404_v19 }
 0x1ca   : > { %v568_v20 = vpop.permute.xlu0 %567 }
 0x1cb   : > { %v570_v21 = vmul.f32 %v2404_v19, %v568_v20 }
 0x1cd   : > { %572 = vrot.lane.b32.xlu0 %v570_v21, %s2644_s18 }
 0x23f   : > { %v573_v22 = vpop.permute.xlu0 %572 }
 0x240   : > { %v575_v23 = vadd.f32 %v573_v22, %v477_v14 }
 0x242   : > { %2405 = vtanh.f32 %v575_v23 }
 0x24f   : > { %v2406_v24 = vpop.eup %2405 }
 0x250   : > { %579 = vrot.lane.b32.xlu1 %v2406_v24, %s2645_s20 }
 0x254   : > { %583 = vrot.lane.b32.xlu1 %v396_v6, %s2646_s29  ;;  %s3037_s29 = sadd.s32 %s958_s23, %s2968_s8 }
 0x255   : > { %s2134_s27 = sshll.u32 %s3037_s29, 1 }
 0x256   : > { %s961_s15 = scalar_lea.vmem [#allocation2], %s2134_s27  ;;  %s1138_s28 = scalar_lea.vmem %s2987_s12, %s2134_s27 [#allocation10] }
 0x257   : > { %v962_v15 = vld [vmem:[%s961_s15] sm:$0x3]  ;;  %s1504_s15 = smul.u32 6, %s2971_s7 }
 0x258   : > { %2258 = vmatmul.mubr.msk.f32.vlgmr.msra.gmra.mxu0 %vm406_vm1, %v962_v15 }
 0x259   : > { %2268 = vmatpush3.msra.mxu0 %v2918_v1  ;;  %2271 = vmatprep.mubr.msk.f32.mxu0 %vm2642_vm0, %v2641_v0 }
 0x25a   : > { %2269 = vmatprep.subr.mxu0 %v2641_v0 }
 0x25b   : > { %2270 = vmatpush3.msra.mxu0 %v2922_v3 }
 0x25c   : > { %2281 = vmatprep.subr.mxu0 %v2641_v0 }
 0x2c2   : > { %v580_v26 = vpop.permute.xlu1 %579 }
 0x2c3   : > { %v582_v29 = vmul.f32 %v580_v26, %v577_v27 }
 0x2c6   : > { %v584_v28 = vpop.permute.xlu1 %583 }
 0x2c7   : > { %v586_v30 = vmul.f32 %v2404_v19, %v584_v28 }
 0x2c9   : > { %v587_v31 = vadd.f32 %v586_v30, %v582_v29 }
 0x2cb   : > { %589 = vrot.lane.b32.xlu0 %v587_v31, %s2645_s20 }
 0x318   : > { %v1032_v22 = vpop.f32.mrf.mxu0 }
 0x319   : > { %v1033_v27 = vadd.f32 %v2962_v13, %v1032_v22 }
 0x31a   : > { %v2259_v23 = vpop.f32.mrf.mxu0 }
 0x33d   : > { %v590_v32 = vpop.permute.xlu0 %589 }
 0x33e   : > { %594 = vst.msk [vmem:[%s592_s30] sm:$0x3] %vm593_vm2, %v590_v32  ;;  %2237 = vmatmul.mubr.msk.f32.vlgmr.msra.gmra.mxu1 %vm406_vm1, %v590_v32  ;;  %s3068_s30 = sadd.s32 %s2138_s17, %s2968_s8 }
 0x33f   : > { %2247 = vmatpush3.msra.mxu1 %v2920_v2  ;;  %2250 = vmatprep.mubr.msk.f32.mxu1 %vm2642_vm0, %v2641_v0  ;;  %s2139_s2 = sshll.u32 %s3068_s30, 1 }
 0x340   : > { %2248 = vmatprep.subr.mxu1 %v2641_v0  ;;  %s1143_s16 = scalar_lea.vmem [#allocation2], %s2139_s2  ;;  %s1320_s27 = scalar_lea.vmem %s2987_s12, %s2139_s2 [#allocation10] }
 0x341   : > { %2249 = vmatpush3.msra.mxu1 %v2926_v4 }
 0x342   : > { %2260 = vmatprep.subr.mxu1 %v2641_v0 }
 0x3fe   : > { %v740_v35 = vpop.f32.mrf.mxu1 }
 0x3ff   : > { %v741_v36 = vadd.f32 %v2955_v7, %v740_v35 }
 0x400   : > { %v2238_v37 = vpop.f32.mrf.mxu1 }
 0x401   : > { %752 = vrot.lane.b32.xlu1 %v741_v36, %s2643_s9  ;;  %v744_v39 = vadd.f32 %v741_v36, %v669_v38 }
 0x403   : > { %v2128_v40 = vmul.f32 -1.442695, %v744_v39 }
 0x405   : > { %2407 = vpow2.f32 %v2128_v40 }
 0x412   : > { %v2408_v41 = vpop.eup %2407 }
 0x413   : > { %v748_v42 = vadd.f32 1.0, %v2408_v41 }
 0x415   : > { %2409 = vrcp.f32 %v748_v42 }
 0x422   : > { %v2410_v43 = vpop.eup %2409 }
 0x423   : > { %v762_v50 = vsub.f32 1.0, %v2410_v43  ;;  %v768_v52 = vmul.f32 %v2410_v43, %v587_v31 }
 0x473   : > { %v753_v44 = vpop.permute.xlu1 %752 }
 0x474   : > { %v755_v45 = vmul.f32 %v2410_v43, %v753_v44 }
 0x476   : > { %757 = vrot.lane.b32.xlu0 %v755_v45, %s2644_s18 }
 0x4e8   : > { %v758_v46 = vpop.permute.xlu0 %757 }
 0x4e9   : > { %v760_v47 = vadd.f32 %v758_v46, %v669_v38  ;;  %v1144_v38 = vld [vmem:[%s1143_s16] sm:$0x3]  ;;  %s1686_s16 = smul.u32 7, %s2971_s7 }
 0x4ea   : > { %2272 = vmatmul.mubr.msk.f32.vlgmr.msra.gmra.mxu0 %vm406_vm1, %v1144_v38 }
 0x4eb   : > { %2411 = vtanh.f32 %v760_v47  ;;  %2282 = vmatpush3.msra.mxu0 %v2918_v1  ;;  %2285 = vmatprep.mubr.msk.f32.mxu0 %vm2642_vm0, %v2641_v0 }
 0x4ec   : > { %2283 = vmatprep.subr.mxu0 %v2641_v0 }
 0x4ed   : > { %2284 = vmatpush3.msra.mxu0 %v2922_v3 }
 0x4ee   : > { %2295 = vmatprep.subr.mxu0 %v2641_v0 }
 0x4f8   : > { %v2412_v48 = vpop.eup %2411 }
 0x4f9   : > { %764 = vrot.lane.b32.xlu1 %v2412_v48, %s2645_s20 }
 0x56b   : > { %v765_v51 = vpop.permute.xlu1 %764 }
 0x56c   : > { %v767_v53 = vmul.f32 %v765_v51, %v762_v50 }
 0x56e   : > { %v769_v54 = vadd.f32 %v768_v52, %v767_v53 }
 0x570   : > { %771 = vrot.lane.b32.xlu0 %v769_v54, %s2645_s20 }
 0x5aa   : > { %v1214_v45 = vpop.f32.mrf.mxu0 }
 0x5ab   : > { %v1215_v50 = vadd.f32 %v2962_v13, %v1214_v45 }
 0x5ac   : > { %v2273_v46 = vpop.f32.mrf.mxu0 }
 0x5e2   : > { %v772_v55 = vpop.permute.xlu0 %771 }
 0x5e3   : > { %775 = vst.msk [vmem:[%s774_s1] sm:$0x3] %vm593_vm2, %v772_v55  ;;  %2251 = vmatmul.mubr.msk.f32.vlgmr.msra.gmra.mxu1 %vm406_vm1, %v772_v55  ;;  %s3099_s1 = sadd.s32 %s1322_s10, %s2968_s8 }
 0x5e4   : > { %2261 = vmatpush3.msra.mxu1 %v2920_v2  ;;  %2264 = vmatprep.mubr.msk.f32.mxu1 %vm2642_vm0, %v2641_v0  ;;  %s2143_s23 = sshll.u32 %s3099_s1, 1 }
 0x5e5   : > { %2262 = vmatprep.subr.mxu1 %v2641_v0  ;;  %s1325_s29 = scalar_lea.vmem [#allocation2], %s2143_s23  ;;  %s1502_s2 = scalar_lea.vmem %s2987_s12, %s2143_s23 [#allocation10] }
 0x5e6   : > { %2263 = vmatpush3.msra.mxu1 %v2926_v4 }
 0x5e7   : > { %2274 = vmatprep.subr.mxu1 %v2641_v0 }
 0x6a3   : > { %v922_v58 = vpop.f32.mrf.mxu1 }
 0x6a4   : > { %v923_v59 = vadd.f32 %v2955_v7, %v922_v58 }
 0x6a5   : > { %v2252_v60 = vpop.f32.mrf.mxu1 }
 0x6a6   : > { %934 = vrot.lane.b32.xlu1 %v923_v59, %s2643_s9  ;;  %v926_v62 = vadd.f32 %v923_v59, %v851_v61 }
 0x6a8   : > { %v2133_v63 = vmul.f32 -1.442695, %v926_v62 }
 0x6aa   : > { %2413 = vpow2.f32 %v2133_v63 }
 0x6b7   : > { %v2414_v5 = vpop.eup %2413 }
 0x6b8   : > { %v930_v6 = vadd.f32 1.0, %v2414_v5 }
 0x6ba   : > { %2415 = vrcp.f32 %v930_v6 }
 0x6c7   : > { %v2416_v8 = vpop.eup %2415 }
 0x6c8   : > { %v944_v16 = vsub.f32 1.0, %v2416_v8  ;;  %v950_v18 = vmul.f32 %v2416_v8, %v769_v54 }
 0x718   : > { %v935_v9 = vpop.permute.xlu1 %934 }
 0x719   : > { %v937_v10 = vmul.f32 %v2416_v8, %v935_v9 }
 0x71b   : > { %939 = vrot.lane.b32.xlu0 %v937_v10, %s2644_s18 }
 0x78d   : > { %v940_v11 = vpop.permute.xlu0 %939 }
 0x78e   : > { %v942_v12 = vadd.f32 %v940_v11, %v851_v61  ;;  %v1326_v61 = vld [vmem:[%s1325_s29] sm:$0x3] }
 0x78f   : > { %2286 = vmatmul.mubr.msk.f32.vlgmr.msra.gmra.mxu0 %vm406_vm1, %v1326_v61 }
 0x790   : > { %2417 = vtanh.f32 %v942_v12  ;;  %2296 = vmatpush3.msra.mxu0 %v2918_v1  ;;  %2299 = vmatprep.mubr.msk.f32.mxu0 %vm2642_vm0, %v2641_v0 }
 0x791   : > { %2297 = vmatprep.subr.mxu0 %v2641_v0 }
 0x792   : > { %2298 = vmatpush3.msra.mxu0 %v2922_v3 }
 0x793   : > { %2309 = vmatprep.subr.mxu0 %v2641_v0 }
 0x79d   : > { %v2418_v14 = vpop.eup %2417 }
 0x79e   : > { %946 = vrot.lane.b32.xlu1 %v2418_v14, %s2645_s20 }
 0x810   : > { %v947_v17 = vpop.permute.xlu1 %946 }
 0x811   : > { %v949_v19 = vmul.f32 %v947_v17, %v944_v16 }
 0x813   : > { %v951_v20 = vadd.f32 %v950_v18, %v949_v19 }
 0x815   : > { %953 = vrot.lane.b32.xlu0 %v951_v20, %s2645_s20 }
 0x84f   : > { %v1396_v10 = vpop.f32.mrf.mxu0 }
 0x850   : > { %v1397_v16 = vadd.f32 %v2962_v13, %v1396_v10 }
 0x851   : > { %v2287_v11 = vpop.f32.mrf.mxu0 }
 0x887   : > { %v954_v21 = vpop.permute.xlu0 %953 }
 0x888   : > { %957 = vst.msk [vmem:[%s956_s11] sm:$0x3] %vm593_vm2, %v954_v21  ;;  %2265 = vmatmul.mubr.msk.f32.vlgmr.msra.gmra.mxu1 %vm406_vm1, %v954_v21  ;;  %s3130_s11 = sadd.s32 %s1504_s15, %s2968_s8 }
 0x889   : > { %2275 = vmatpush3.msra.mxu1 %v2920_v2  ;;  %2278 = vmatprep.mubr.msk.f32.mxu1 %vm2642_vm0, %v2641_v0  ;;  %s2147_s17 = sshll.u32 %s3130_s11, 1  ;;  %s1869_s11 = scalar_lea.sflag [#allocation4], %s2894_s14 }
 0x88a   : > { %2276 = vmatprep.subr.mxu1 %v2641_v0  ;;  %s1507_s30 = scalar_lea.vmem [#allocation2], %s2147_s17  ;;  %s1684_s23 = scalar_lea.vmem %s2987_s12, %s2147_s17 [#allocation10] }
 0x88b   : > { %2277 = vmatpush3.msra.mxu1 %v2926_v4 }
 0x88c   : > { %2288 = vmatprep.subr.mxu1 %v2641_v0 }
 0x948   : > { %v1104_v24 = vpop.f32.mrf.mxu1 }
 0x949   : > { %v1105_v25 = vadd.f32 %v2955_v7, %v1104_v24 }
 0x94a   : > { %v2266_v26 = vpop.f32.mrf.mxu1 }
 0x94b   : > { %1116 = vrot.lane.b32.xlu1 %v1105_v25, %s2643_s9  ;;  %v1108_v28 = vadd.f32 %v1105_v25, %v1033_v27 }
 0x94d   : > { %v2137_v29 = vmul.f32 -1.442695, %v1108_v28 }
 0x94f   : > { %2419 = vpow2.f32 %v2137_v29 }
 0x95c   : > { %v2420_v30 = vpop.eup %2419 }
 0x95d   : > { %v1112_v31 = vadd.f32 1.0, %v2420_v30 }
 0x95f   : > { %2421 = vrcp.f32 %v1112_v31 }
 0x96c   : > { %v2422_v32 = vpop.eup %2421 }
 0x96d   : > { %v1126_v39 = vsub.f32 1.0, %v2422_v32  ;;  %v1132_v41 = vmul.f32 %v2422_v32, %v951_v20 }
 0x9bd   : > { %v1117_v33 = vpop.permute.xlu1 %1116 }
 0x9be   : > { %v1119_v34 = vmul.f32 %v2422_v32, %v1117_v33 }
 0x9c0   : > { %1121 = vrot.lane.b32.xlu0 %v1119_v34, %s2644_s18 }
 0xa32   : > { %v1122_v35 = vpop.permute.xlu0 %1121 }
 0xa33   : > { %v1124_v36 = vadd.f32 %v1122_v35, %v1033_v27  ;;  %v1508_v27 = vld [vmem:[%s1507_s30] sm:$0x3] }
 0xa34   : > { %2300 = vmatmul.mubr.msk.f32.vlgmr.msra.gmra.mxu0 %vm406_vm1, %v1508_v27 }
 0xa35   : > { %2423 = vtanh.f32 %v1124_v36  ;;  %2310 = vmatpush3.msra.mxu0 %v2918_v1  ;;  %2313 = vmatprep.mubr.msk.f32.mxu0 %vm2642_vm0, %v2641_v0 }
 0xa36   : > { %2311 = vmatprep.subr.mxu0 %v2641_v0 }
 0xa37   : > { %2312 = vmatpush3.msra.mxu0 %v2922_v3 }
 0xa42   : > { %v2424_v37 = vpop.eup %2423 }
 0xa43   : > { %1128 = vrot.lane.b32.xlu1 %v2424_v37, %s2645_s20 }
 0xab5   : > { %v1129_v40 = vpop.permute.xlu1 %1128 }
 0xab6   : > { %v1131_v42 = vmul.f32 %v1129_v40, %v1126_v39 }
 0xab8   : > { %v1133_v43 = vadd.f32 %v1132_v41, %v1131_v42 }
 0xaba   : > { %1135 = vrot.lane.b32.xlu0 %v1133_v43, %s2645_s20 }
 0xaf4   : > { %v1578_v1 = vpop.f32.mrf.mxu0 }
 0xaf5   : > { %v1579_v37 = vadd.f32 %v2962_v13, %v1578_v1 }
 0xaf6   : > { %v2301_v3 = vpop.f32.mrf.mxu0 }
 0xb2c   : > { %v1136_v44 = vpop.permute.xlu0 %1135 }
 0xb2d   : > { %1139 = vst.msk [vmem:[%s1138_s28] sm:$0x3] %vm593_vm2, %v1136_v44  ;;  %2279 = vmatmul.mubr.msk.f32.vlgmr.msra.gmra.mxu1 %vm406_vm1, %v1136_v44  ;;  %s3159_s28 = sadd.s32 %s1686_s16, %s2968_s8  ;;  %s2162_s8 = sshll.u32 %s2767_s19, 8 }
 0xb2e   : > { %2289 = vmatpush3.msra.mxu1 %v2920_v2  ;;  %2292 = vmatprep.mubr.msk.f32.mxu1 %vm2642_vm0, %v2641_v0  ;;  %s2151_s10 = sshll.u32 %s3159_s28, 1  ;;  %s3187_s15 = scalar_lea.hbm %s3239_s6, %s2162_s8 }
 0xb2f   : > { %2290 = vmatprep.subr.mxu1 %v2641_v0  ;;  %s1689_s1 = scalar_lea.vmem [#allocation2], %s2151_s10  ;;  %s1866_s7 = scalar_lea.vmem %s2987_s12, %s2151_s10 [#allocation10] }
 0xb30   : > { %2291 = vmatpush3.msra.mxu1 %v2926_v4  ;;  %v1690_v45 = vld [vmem:[%s1689_s1] sm:$0x3]  ;;  %s2647_s19 = smov [#allocation10]  }
 0xb31   : > { %2302 = vmatprep.subr.mxu1 %v2641_v0  ;;  %2314 = vmatmul.mubr.msk.f32.vlgmr.msra.gmra.mxu0 %vm406_vm1, %v1690_v45 }
 0xbed   : > { %v1286_v47 = vpop.f32.mrf.mxu1 }
 0xbee   : > { %v1287_v48 = vadd.f32 %v2955_v7, %v1286_v47 }
 0xbef   : > { %v2280_v49 = vpop.f32.mrf.mxu1 }
 0xbf0   : > { %1298 = vrot.lane.b32.xlu1 %v1287_v48, %s2643_s9  ;;  %v1290_v51 = vadd.f32 %v1287_v48, %v1215_v50 }
 0xbf2   : > { %v2142_v52 = vmul.f32 -1.442695, %v1290_v51 }
 0xbf4   : > { %2425 = vpow2.f32 %v2142_v52  ;;  %v1760_v52 = vpop.f32.mrf.mxu0 }
 0xc01   : > { %v2426_v53 = vpop.eup %2425 }
 0xc02   : > { %v1294_v54 = vadd.f32 1.0, %v2426_v53  ;;  %v2315_v53 = vpop.f32.mrf.mxu0 }
 0xc04   : > { %2427 = vrcp.f32 %v1294_v54 }
 0xc11   : > { %v2428_v55 = vpop.eup %2427 }
 0xc12   : > { %v1308_v62 = vsub.f32 1.0, %v2428_v55  ;;  %v1314_v5 = vmul.f32 %v2428_v55, %v1133_v43 }
 0xc62   : > { %v1299_v56 = vpop.permute.xlu1 %1298 }
 0xc63   : > { %v1301_v57 = vmul.f32 %v2428_v55, %v1299_v56 }
 0xc65   : > { %1303 = vrot.lane.b32.xlu0 %v1301_v57, %s2644_s18  ;;  %v1761_v57 = vadd.f32 %v2962_v13, %v1760_v52 }
 0xcd7   : > { %v1304_v58 = vpop.permute.xlu0 %1303 }
 0xcd8   : > { %v1306_v59 = vadd.f32 %v1304_v58, %v1215_v50 }
 0xcda   : > { %2429 = vtanh.f32 %v1306_v59 }
 0xce7   : > { %v2430_v60 = vpop.eup %2429 }
 0xce8   : > { %1310 = vrot.lane.b32.xlu1 %v2430_v60, %s2645_s20 }
 0xd5a   : > { %v1311_v63 = vpop.permute.xlu1 %1310 }
 0xd5b   : > { %v1313_v6 = vmul.f32 %v1311_v63, %v1308_v62 }
 0xd5d   : > { %v1315_v8 = vadd.f32 %v1314_v5, %v1313_v6 }
 0xd5f   : > { %1317 = vrot.lane.b32.xlu0 %v1315_v8, %s2645_s20 }
 0xdd1   : > { %v1318_v9 = vpop.permute.xlu0 %1317 }
 0xdd2   : > { %1321 = vst.msk [vmem:[%s1320_s27] sm:$0x3] %vm593_vm2, %v1318_v9  ;;  %2293 = vmatmul.mubr.msk.f32.vlgmr.msra.gmra.mxu1 %vm406_vm1, %v1318_v9 }
 0xdd3   : > { %2303 = vmatpush3.msra.mxu1 %v2920_v2  ;;  %2306 = vmatprep.mubr.msk.f32.mxu1 %vm2642_vm0, %v2641_v0 }
 0xdd4   : > { %2304 = vmatprep.subr.mxu1 %v2641_v0 }
 0xdd5   : > { %2305 = vmatpush3.msra.mxu1 %v2926_v4 }
 0xdd6   : > { %2316 = vmatprep.subr.mxu1 %v2641_v0 }
 0xe92   : > { %v1468_v12 = vpop.f32.mrf.mxu1 }
 0xe93   : > { %v1469_v14 = vadd.f32 %v2955_v7, %v1468_v12 }
 0xe94   : > { %v2294_v15 = vpop.f32.mrf.mxu1 }
 0xe95   : > { %1480 = vrot.lane.b32.xlu1 %v1469_v14, %s2643_s9  ;;  %v1472_v17 = vadd.f32 %v1469_v14, %v1397_v16 }
 0xe97   : > { %v2146_v18 = vmul.f32 -1.442695, %v1472_v17 }
 0xe99   : > { %2431 = vpow2.f32 %v2146_v18 }
 0xea6   : > { %v2432_v19 = vpop.eup %2431 }
 0xea7   : > { %v1476_v20 = vadd.f32 1.0, %v2432_v19 }
 0xea9   : > { %2433 = vrcp.f32 %v1476_v20 }
 0xeb6   : > { %v2434_v21 = vpop.eup %2433 }
 0xeb7   : > { %v1490_v28 = vsub.f32 1.0, %v2434_v21  ;;  %v1496_v30 = vmul.f32 %v2434_v21, %v1315_v8 }
 0xf07   : > { %v1481_v22 = vpop.permute.xlu1 %1480 }
 0xf08   : > { %v1483_v23 = vmul.f32 %v2434_v21, %v1481_v22 }
 0xf0a   : > { %1485 = vrot.lane.b32.xlu0 %v1483_v23, %s2644_s18 }
 0xf7c   : > { %v1486_v24 = vpop.permute.xlu0 %1485 }
 0xf7d   : > { %v1488_v25 = vadd.f32 %v1486_v24, %v1397_v16 }
 0xf7f   : > { %2435 = vtanh.f32 %v1488_v25 }
 0xf8c   : > { %v2436_v26 = vpop.eup %2435 }
 0xf8d   : > { %1492 = vrot.lane.b32.xlu1 %v2436_v26, %s2645_s20 }
 0xfff   : > { %v1493_v29 = vpop.permute.xlu1 %1492 }
0x1000   : > { %v1495_v31 = vmul.f32 %v1493_v29, %v1490_v28 }
0x1002   : > { %v1497_v32 = vadd.f32 %v1496_v30, %v1495_v31 }
0x1004   : > { %1499 = vrot.lane.b32.xlu0 %v1497_v32, %s2645_s20 }
0x1076   : > { %v1500_v33 = vpop.permute.xlu0 %1499 }
0x1077   : > { %1503 = vst.msk [vmem:[%s1502_s2] sm:$0x3] %vm593_vm2, %v1500_v33  ;;  %2307 = vmatmul.mubr.msk.f32.vlgmr.msra.gmra.mxu1 %vm406_vm1, %v1500_v33 }
0x1078   : > { %2317 = vmatpush3.msra.mxu1 %v2920_v2  ;;  %2320 = vmatprep.mubr.msk.f32.mxu1 %vm2642_vm0, %v2641_v0 }
0x1079   : > { %2318 = vmatprep.subr.mxu1 %v2641_v0 }
0x107a   : > { %2319 = vmatpush3.msra.mxu1 %v2926_v4 }
0x1137   : > { %v1650_v34 = vpop.f32.mrf.mxu1 }
0x1138   : > { %v1651_v35 = vadd.f32 %v2955_v7, %v1650_v34 }
0x1139   : > { %v2308_v36 = vpop.f32.mrf.mxu1 }
0x113a   : > { %1662 = vrot.lane.b32.xlu1 %v1651_v35, %s2643_s9  ;;  %v1654_v38 = vadd.f32 %v1651_v35, %v1579_v37 }
0x113c   : > { %v2150_v2 = vmul.f32 -1.442695, %v1654_v38 }
0x113e   : > { %2437 = vpow2.f32 %v2150_v2 }
0x114b   : > { %v2438_v39 = vpop.eup %2437 }
0x114c   : > { %v1658_v40 = vadd.f32 1.0, %v2438_v39 }
0x114e   : > { %2439 = vrcp.f32 %v1658_v40 }
0x115b   : > { %v2440_v0 = vpop.eup %2439 }
0x115c   : > { %v1672_v46 = vsub.f32 1.0, %v2440_v0  ;;  %v1678_v48 = vmul.f32 %v2440_v0, %v1497_v32 }
0x11ac   : > { %v1663_v4 = vpop.permute.xlu1 %1662 }
0x11ad   : > { %v1665_v41 = vmul.f32 %v2440_v0, %v1663_v4 }
0x11af   : > { %1667 = vrot.lane.b32.xlu0 %v1665_v41, %s2644_s18 }
0x1221   : > { %v1668_v42 = vpop.permute.xlu0 %1667 }
0x1222   : > { %v1670_v43 = vadd.f32 %v1668_v42, %v1579_v37 }
0x1224   : > { %2441 = vtanh.f32 %v1670_v43 }
0x1231   : > { %v2442_v44 = vpop.eup %2441 }
0x1232   : > { %1674 = vrot.lane.b32.xlu1 %v2442_v44, %s2645_s20 }
0x12a4   : > { %v1675_v47 = vpop.permute.xlu1 %1674 }
0x12a5   : > { %v1677_v49 = vmul.f32 %v1675_v47, %v1672_v46 }
0x12a7   : > { %v1679_v50 = vadd.f32 %v1678_v48, %v1677_v49 }
0x12a9   : > { %1681 = vrot.lane.b32.xlu0 %v1679_v50, %s2645_s20 }
0x131b   : > { %v1682_v51 = vpop.permute.xlu0 %1681 }
0x131c   : > { %1685 = vst.msk [vmem:[%s1684_s23] sm:$0x3] %vm593_vm2, %v1682_v51  ;;  %2321 = vmatmul.mubr.msk.f32.vlgmr.msra.gmra.mxu1 %vm406_vm1, %v1682_v51 }
0x13dc   : > { %v1832_v54 = vpop.f32.mrf.mxu1 }
0x13dd   : > { %v1833_v55 = vadd.f32 %v2955_v7, %v1832_v54 }
0x13de   : > { %v2322_v56 = vpop.f32.mrf.mxu1 }
0x13df   : > { %1844 = vrot.lane.b32.xlu1 %v1833_v55, %s2643_s9  ;;  %v1836_v58 = vadd.f32 %v1833_v55, %v1761_v57  ;;  %s1882_s9 = sshll.u32 %s2987_s12, 4  ;;  %s3179_s9 = int_to_ptr.vmem [resolvable:$true] %s1882_s9 }
0x13e0   : > { %s2559_s17 = scalar_lea.vmem %s3179_s9, 256 }
0x13e1   : > { %v2154_v59 = vmul.f32 -1.442695, %v1836_v58  ;;  %p2560_p3 = scmp.ne.s32.totalorder %s3179_s9, %s2559_s17 }
0x13e3   : > { %2443 = vpow2.f32 %v2154_v59  ;;  %p2561_p7 = pnand %p2560_p3, %p3274_p12 }
0x13e5   : > { %p2562_p0 = pneg %p2561_p7 }
0x13f0   : > { %v2444_v60 = vpop.eup %2443 }
0x13f1   : > { %v1840_v61 = vadd.f32 1.0, %v2444_v60 }
0x13f3   : > { %2445 = vrcp.f32 %v1840_v61 }
0x1400   : > { %v2446_v62 = vpop.eup %2445 }
0x1401   : > { %v1854_v8 = vsub.f32 1.0, %v2446_v62  ;;  %v1860_v10 = vmul.f32 %v2446_v62, %v1679_v50 }
0x1451   : > { %v1845_v63 = vpop.permute.xlu1 %1844 }
0x1452   : > { %v1847_v5 = vmul.f32 %v2446_v62, %v1845_v63 }
0x1454   : > { %1849 = vrot.lane.b32.xlu0 %v1847_v5, %s2644_s18 }
0x14c6   : > { %v1850_v7 = vpop.permute.xlu0 %1849 }
0x14c7   : > { %v1852_v6 = vadd.f32 %v1850_v7, %v1761_v57 }
0x14c9   : > { %2447 = vtanh.f32 %v1852_v6 }
0x14d6   : > { %v2448_v13 = vpop.eup %2447 }
0x14d7   : > { %1856 = vrot.lane.b32.xlu1 %v2448_v13, %s2645_s20 }
0x1549   : > { %v1857_v9 = vpop.permute.xlu1 %1856 }
0x154a   : > { %v1859_v11 = vmul.f32 %v1857_v9, %v1854_v8 }
0x154c   : > { %v1861_v12 = vadd.f32 %v1860_v10, %v1859_v11 }
0x154e   : > { %1863 = vrot.lane.b32.xlu0 %v1861_v12, %s2645_s20  ;;  %s2563_s20 = sshll.u32 %s2647_s19, 4  ;;  %s2564_s20 = int_to_ptr.vmem [resolvable:$false] %s2563_s20 }
0x154f   : > { %s2565_s30 = scalar_lea.vmem %s2564_s20, 512  ;;  %p2566_p13 = scmp.lt.s32.totalorder %s3179_s9, %s2564_s20 }
0x1550   : > { %p2567_p1 = scmp.lt.s32.totalorder %s2565_s30, %s2559_s17 }
0x1552   : > { %p2568_p5 = por %p2567_p1, %p2566_p13 }
0x1554   : > { %p2569_p9 = pnand %p2568_p5, %p2562_p0 }
0x15c0   : > { %v1864_v14 = vpop.permute.xlu0 %1863 }
0x15c1   : > { %1867 = vst.msk [vmem:[%s1866_s7] sm:$0x3] %vm593_vm2, %v1864_v14 }
0x15c2   : > { %2572 = shalt.err (!%p2569_p9)
}
0x15c3   : > { %s2573_s12 = scalar_lea.hbm %s3187_s15, 256  ;;  %s2577_s28 = scalar_lea.hbm %s3239_s6, 512 }
0x15c4   : > { %p2574_p10 = scmp.ne.s32.totalorder %s3187_s15, %s2573_s12  ;;  %p2578_p2 = scmp.lt.s32.totalorder %s3187_s15, %s3239_s6 }
0x15c5   : > { %p2579_p6 = scmp.lt.s32.totalorder %s2577_s28, %s2573_s12 }
0x15c6   : > { %p2575_p8 = pnand %p2574_p10, %p3274_p12 }
0x15c7   : > { %p2580_p4 = por %p2579_p6, %p2578_p2 }
0x15c8   : > { %p2576_p11 = pneg %p2575_p8 }
0x15ca   : > { %p2581_p3 = pnand %p2580_p4, %p2576_p11 }
0x15cc   : > { %2584 = shalt.err (!%p2581_p3)
}
0x15cd   : > { %s2648_s23 = smov 2  }
0x15ce   : > { %2333 = dma.vmem_to_hbm [thread:$0]  (%p3274_p12), %s3179_s9, 256, %s3187_s15, %s1869_s11, %s2644_s18, %s2644_s18, %s2648_s23  }
0x15cf PF: > { %s1897_s8 = sand.u32 1, %s2619_s21   ;;  %p3275_p7 = scmp.ne.s32.totalorder %s3261_s26, 0 }
0x15d0   : > { %p3276_p0 = scmp.ge.s32.totalorder %s2631_s24, 2  ;;  %s1898_s7 = scalar_lea.sflag [#allocation4], %s1897_s8 }
0x15d2   : > { %p2350_p13 = pnand %p3276_p0, %p3275_p7 }
0x15d4   : > { %p2351_p1 = pneg %p2350_p13 }
0x15d6   : > { %2614 = dma.done.wait (%p2351_p1), %s1898_s7, 256  }
0x15d7   : > { %2616 = vsyncadd (%p2351_p1), %s1898_s7, 4294967040  ;;  %s3277_s13 = sld [smem:[#allocation15_spill]]  ;;  %p23_p5 = scmp.ge.s32.totalorder %s2705_s25, 4  }
0x15d8   : > { %s3278_s23 = sld [smem:[#allocation16_spill]]  ;;  %s3279_s21 = smov %s2623_s22 }
0x15d9   : > { %s3281_s24 = smov %s2705_s25  ;;  %25 = sbr.rel (!%p23_p5) target bundleno = 11 (0xb), region = 140 }
0x15dd   : > { %s3280_s22 = smov %s3277_s13 }
0x15de   :  { %1903 = vsyncpa [#allocation3], 1 }
0x15df   :  { %1905 = vsyncpa [#allocation3 + $0x1], 1 }
0x15e0   :  { %1906 = vsyncpa [#allocation6], 1 }
0x15e1   :  { %1908 = vsyncpa [#allocation6 + $0x1], 1 }
0x15e2   :  { %1909 = vsyncpa [#allocation9], 1 }
0x15e3   :  { %1911 = vsyncpa [#allocation9 + $0x1], 1 }
0x15e4   :  { %1912 = vsyncpa [#allocation4], 1 }
0x15e5   :  { %1914 = vsyncpa [#allocation4 + $0x1], 1 }

</bundles_post_ra>
